<compile_context>
chip_gen: v6e
topology: v6e:2x2x1
jax: 0.10.0
libtpu: 0.0.40
codegen_flags: <defaults>
</compile_context>

<pallas_src>
import functools
import jax
import jax.numpy as jnp
from jax.experimental import pallas as pl
from jax.experimental.pallas import tpu as pltpu

COMPUTE_DTYPE = jnp.bfloat16       # MXU operand dtype (accum / epilogue stay f32)
_TILE_TARGET_M = 4096              # review: 2048-4096 row tiles (was 512)
_ALIGN = 16                        # bf16 sublane packing granularity


@functools.lru_cache(maxsize=None)
def _vmem_limit_bytes():
    """Generation-aware scoped-VMEM limit: ~half of physical VMEM, clamped to
    [32 MiB, 96 MiB] (v5e/v6e -> 64 MiB, v7x -> 32 MiB).  Falls back to a safe
    32 MiB if the hardware query is unavailable."""
    try:
        cap = getattr(pltpu.get_tpu_info(), "vmem_capacity_bytes", None)
    except Exception:
        cap = None
    if not cap:
        return 32 * 1024 * 1024
    return int(min(96 * 1024 * 1024, max(32 * 1024 * 1024, cap // 2)))


def _pick_tile_m(m, target=_TILE_TARGET_M, align=_ALIGN):
    """Row-tile choice.
      * tiny m: full extent (block dim == array dim is always legal),
      * otherwise: largest 16-aligned divisor of m that is <= target and
        <= m//2, so the row grid has >= 2 steps (v7x megacore) and per-step
        VMEM stays bounded,
      * if no aligned divisor exists: a 16-aligned cap + masked edge tile via
        a pl.cdiv grid (never the old tm == m fallback)."""
    if m <= align:
        return m
    cap = min(target, max(align, (m // 2 // align) * align))
    for t in range(cap, align - 1, -align):
        if m % t == 0:
            return t
    return cap


# ---------------------------------------------------------------------------
# Pallas kernels
# ---------------------------------------------------------------------------
def _conv_pool_kernel(p00_ref, p01_ref, p10_ref, p11_ref, w_ref, b_ref, o_ref):
    """Fused conv-as-matmul + bias + ReLU + 2x2 max-pool epilogue.

    p{di}{dj} holds im2col patches of the conv outputs landing at pool offset
    (di, dj).  Bias is shared and ReLU is monotonic, so we max the raw dots,
    then add bias, then ReLU."""
    w = w_ref[...]
    d00 = jnp.dot(p00_ref[...], w, preferred_element_type=jnp.float32)
    d01 = jnp.dot(p01_ref[...], w, preferred_element_type=jnp.float32)
    d10 = jnp.dot(p10_ref[...], w, preferred_element_type=jnp.float32)
    d11 = jnp.dot(p11_ref[...], w, preferred_element_type=jnp.float32)
    acc = jnp.maximum(jnp.maximum(d00, d01), jnp.maximum(d10, d11))
    o_ref[...] = jnp.maximum(acc + b_ref[...], 0.0).astype(o_ref.dtype)


def _mlp_kernel(x_ref, w1_ref, b1_ref, w2_ref, b2_ref, w3_ref, b3_ref, o_ref):
    """fc1+ReLU -> fc2+ReLU -> fc3 fused; intermediates never leave VMEM/vregs."""
    h = jnp.dot(x_ref[...], w1_ref[...], preferred_element_type=jnp.float32)
    h = jnp.maximum(h + b1_ref[...], 0.0).astype(x_ref.dtype)
    h = jnp.dot(h, w2_ref[...], preferred_element_type=jnp.float32)
    h = jnp.maximum(h + b2_ref[...], 0.0).astype(x_ref.dtype)
    h = jnp.dot(h, w3_ref[...], preferred_element_type=jnp.float32)
    o_ref[...] = (h + b3_ref[...]).astype(o_ref.dtype)


# ---------------------------------------------------------------------------
# Pallas wrappers
# ---------------------------------------------------------------------------
def conv_relu_pool(x_nhwc, w_packed, b_row, kh, kw):
    """x:(N,H,W,C) NHWC, w_packed:(KH*KW*C, Cout), b_row:(1, Cout).
    Returns maxpool2x2(ReLU(conv(x))) as (N, OH//2, OW//2, Cout) NHWC."""
    n, h, w, c = x_nhwc.shape
    oh, ow = h - kh + 1, w - kw + 1
    ph, pw = oh // 2, ow // 2
    cout = w_packed.shape[1]
    k = kh * kw * c

    # im2col: one patch matrix per 2x2 pool offset; rows ordered (n, ph, pw),
    # patch entries ordered (kh, kw, c) to match the packed weight.
    # With allow_input_fusion below, XLA is allowed to fuse this slice/stack/
    # reshape producer chain (and the entry layout transpose) into the Pallas
    # operands instead of round-tripping ~25x-amplified patch tensors via HBM.
    # TODO(synk): long-term, build the patches inside the kernel from the raw
    # activation tile (batch-in-lanes layout) so the gather never leaves VMEM.
    def patches(di, dj):
        cols = []
        for i in range(kh):
            for j in range(kw):
                cols.append(x_nhwc[:, di + i: di + i + 2 * ph: 2,
                                   dj + j: dj + j + 2 * pw: 2, :])
        p = jnp.stack(cols, axis=3)                    # (N, ph, pw, KH*KW, C)
        return p.reshape(n * ph * pw, k)

    ps = [patches(di, dj) for di in (0, 1) for dj in (0, 1)]

    m = n * ph * pw
    tm = _pick_tile_m(m)
    grid = (pl.cdiv(m, tm),)                           # masked edge tile if ragged
    patch_spec = pl.BlockSpec((tm, k), lambda i: (i, 0))
    out = pl.pallas_call(
        _conv_pool_kernel,
        out_shape=jax.ShapeDtypeStruct((m, cout), COMPUTE_DTYPE),
        grid=grid,
        in_specs=[patch_spec] * 4 + [
            pl.BlockSpec((k, cout), lambda i: (0, 0)),   # weight: resident
            pl.BlockSpec((1, cout), lambda i: (0, 0)),   # bias: resident
        ],
        # TODO(synk): cout=6/16 lane-sparse stores (vst.msk); pack channels /
        # pool offsets into a lane-denser output slab if the store path ever
        # dominates (secondary: output bytes << patch-operand bytes).
        out_specs=pl.BlockSpec((tm, cout), lambda i: (i, 0)),
        compiler_params=pltpu.CompilerParams(
            dimension_semantics=("parallel",),
            vmem_limit_bytes=_vmem_limit_bytes(),
            allow_input_fusion=[True] * 4 + [False, False]),
    )(*ps, w_packed, b_row)
    return out.reshape(n, ph, pw, cout)


def mlp(x, w1, b1, w2, b2, w3, b3):
    """Fused fc1(ReLU) -> fc2(ReLU) -> fc3 over row tiles of x:(N, 400)."""
    m = x.shape[0]
    tm = _pick_tile_m(m)
    grid = (pl.cdiv(m, tm),)

    def fixed(shape):
        return pl.BlockSpec(shape, lambda i: (0, 0))

    return pl.pallas_call(
        _mlp_kernel,
        out_shape=jax.ShapeDtypeStruct((m, w3.shape[1]), jnp.float32),
        grid=grid,
        in_specs=[pl.BlockSpec((tm, x.shape[1]), lambda i: (i, 0)),
                  fixed(w1.shape), fixed(b1.shape),
                  fixed(w2.shape), fixed(b2.shape),
                  fixed(w3.shape), fixed(b3.shape)],
        out_specs=pl.BlockSpec((tm, w3.shape[1]), lambda i: (i, 0)),
        compiler_params=pltpu.CompilerParams(
            dimension_semantics=("parallel",),
            vmem_limit_bytes=_vmem_limit_bytes(),
            allow_input_fusion=[True] + [False] * 6),
    )(x, w1, b1, w2, b2, w3, b3)


# ---------------------------------------------------------------------------
# Parameters (PyTorch convention) + one-time kernel-layout packing
# ---------------------------------------------------------------------------
def init_params(key):
    """PyTorch-convention params: conv (Cout,Cin,KH,KW); fc1 input = NCHW flatten."""
    def conv_init(k, co, ci, ksz):
        bound = 1.0 / (ci * ksz * ksz) ** 0.5
        k1, k2 = jax.random.split(k)
        w = jax.random.uniform(k1, (co, ci, ksz, ksz), jnp.float32, -bound, bound)
        b = jax.random.uniform(k2, (co,), jnp.float32, -bound, bound)
        return w, b

    def lin_init(k, out_f, in_f):
        bound = 1.0 / in_f ** 0.5
        k1, k2 = jax.random.split(k)
        w = jax.random.uniform(k1, (in_f, out_f), jnp.float32, -bound, bound)
        b = jax.random.uniform(k2, (out_f,), jnp.float32, -bound, bound)
        return w, b

    keys = jax.random.split(key, 5)
    return {
        "conv1": conv_init(keys[0], 6, 3, 5),
        "conv2": conv_init(keys[1], 16, 6, 5),
        "fc1": lin_init(keys[2], 120, 16 * 5 * 5),
        "fc2": lin_init(keys[3], 84, 120),
        "fc3": lin_init(keys[4], 10, 84),
    }


def pack_params(params):
    """One-time repack (outside the forward path):
       * conv weights -> (KH*KW*Cin, Cout) matching the (kh, kw, c) patch order
       * fc1 rows permuted from NCHW flatten (c,h,w) to NHWC flatten (h,w,c)
       * matmul operands cast to bf16; biases stay f32 row vectors."""
    def conv_pack(w, b):
        co, ci, kh, kw = w.shape
        wp = w.transpose(2, 3, 1, 0).reshape(kh * kw * ci, co)
        return wp.astype(COMPUTE_DTYPE), b.reshape(1, co).astype(jnp.float32)

    def lin_pack(w, b):
        return w.astype(COMPUTE_DTYPE), b.reshape(1, -1).astype(jnp.float32)

    w1, b1 = params["fc1"]                               # (400,120), rows (c,h,w)
    w1 = w1.reshape(16, 5, 5, 120).transpose(1, 2, 0, 3).reshape(400, 120)
    return {
        "conv1": conv_pack(*params["conv1"]),
        "conv2": conv_pack(*params["conv2"]),
        "fc1": lin_pack(w1, b1),
        "fc2": lin_pack(*params["fc2"]),
        "fc3": lin_pack(*params["fc3"]),
    }


# ---------------------------------------------------------------------------
# Net forward
# ---------------------------------------------------------------------------
def net_forward(packed, x):
    # x: (N, 3, 32, 32) NCHW (PyTorch layout). Single transpose to NHWC at the
    # entry; with allow_input_fusion it can fuse into the conv1 patch operands.
    n = x.shape[0]
    x = x.transpose(0, 2, 3, 1).astype(COMPUTE_DTYPE)        # (N, 32, 32, 3)
    x = conv_relu_pool(x, *packed["conv1"], 5, 5)            # (N, 14, 14, 6)
    x = conv_relu_pool(x, *packed["conv2"], 5, 5)            # (N, 5, 5, 16)
    x = x.reshape(n, 5 * 5 * 16)                             # NHWC flatten (h,w,c)
    w1, b1 = packed["fc1"]
    w2, b2 = packed["fc2"]
    w3, b3 = packed["fc3"]
    return mlp(x, w1, b1, w2, b2, w3, b3)                    # (N, 10) f32


if __name__ == "__main__":
    key = jax.random.PRNGKey(0)
    kp, kx = jax.random.split(key)
    params = init_params(kp)
    packed = pack_params(params)                             # one-time weight repack
    x = jax.random.normal(kx, (2, 3, 32, 32), jnp.float32)   # CIFAR-sized input
    out = jax.jit(net_forward)(packed, x)
    jax.block_until_ready(out)
    assert out.shape == (2, 10) and out.dtype == jnp.float32
    print("KERNEL_OK")
</pallas_src>

<mosaic_0001>
module attributes {stable_mosaic.version = 11 : i64} {
  func.func @_conv_pool_kernel(%arg0: i32, %arg1: memref<192x75xbf16, #tpu.memory_space<vmem>>, %arg2: memref<192x75xbf16, #tpu.memory_space<vmem>>, %arg3: memref<192x75xbf16, #tpu.memory_space<vmem>>, %arg4: memref<192x75xbf16, #tpu.memory_space<vmem>>, %arg5: memref<75x6xbf16, #tpu.memory_space<vmem>>, %arg6: memref<1x6xf32, #tpu.memory_space<vmem>>, %arg7: memref<192x6xbf16, #tpu.memory_space<vmem>>) attributes {dimension_semantics = [#tpu.dimension_semantics<parallel>], iteration_bounds = array<i64: 3>, scalar_prefetch = 0 : i64, scratch_operands = 0 : i64, tpu.core_type = #tpu.core_type<tc>, window_params = [{transform_indices = @transform_0, window_bounds = array<i64: 192, 75>}, {transform_indices = @transform_1, window_bounds = array<i64: 192, 75>}, {transform_indices = @transform_2, window_bounds = array<i64: 192, 75>}, {transform_indices = @transform_3, window_bounds = array<i64: 192, 75>}, {pipeline_mode = #tpu.pipeline_mode<synchronous>, transform_indices = @transform_4, window_bounds = array<i64: 75, 6>}, {pipeline_mode = #tpu.pipeline_mode<synchronous>, transform_indices = @transform_5, window_bounds = array<i64: 1, 6>}, {transform_indices = @transform_6, window_bounds = array<i64: 192, 6>}]} {
    %c0 = arith.constant 0 : index
    %c0_0 = arith.constant 0 : index
    %0 = vector.load %arg5[%c0, %c0_0] : memref<75x6xbf16, #tpu.memory_space<vmem>>, vector<75x6xbf16>
    %c0_1 = arith.constant 0 : index
    %c0_2 = arith.constant 0 : index
    %1 = vector.load %arg1[%c0_1, %c0_2] : memref<192x75xbf16, #tpu.memory_space<vmem>>, vector<192x75xbf16>
    %cst = arith.constant dense<0.000000e+00> : vector<192x6xf32>
    %2 = tpu.matmul %1, %0, %cst {dimension_numbers = #tpu.dot_dimension_numbers<[1], [0], [0], [1], [0, 0, 1, 1], [], []>} : vector<192x75xbf16>, vector<75x6xbf16>, vector<192x6xf32> -> vector<192x6xf32>
    %c0_3 = arith.constant 0 : index
    %c0_4 = arith.constant 0 : index
    %3 = vector.load %arg2[%c0_3, %c0_4] : memref<192x75xbf16, #tpu.memory_space<vmem>>, vector<192x75xbf16>
    %cst_5 = arith.constant dense<0.000000e+00> : vector<192x6xf32>
    %4 = tpu.matmul %3, %0, %cst_5 {dimension_numbers = #tpu.dot_dimension_numbers<[1], [0], [0], [1], [0, 0, 1, 1], [], []>} : vector<192x75xbf16>, vector<75x6xbf16>, vector<192x6xf32> -> vector<192x6xf32>
    %c0_6 = arith.constant 0 : index
    %c0_7 = arith.constant 0 : index
    %5 = vector.load %arg3[%c0_6, %c0_7] : memref<192x75xbf16, #tpu.memory_space<vmem>>, vector<192x75xbf16>
    %cst_8 = arith.constant dense<0.000000e+00> : vector<192x6xf32>
    %6 = tpu.matmul %5, %0, %cst_8 {dimension_numbers = #tpu.dot_dimension_numbers<[1], [0], [0], [1], [0, 0, 1, 1], [], []>} : vector<192x75xbf16>, vector<75x6xbf16>, vector<192x6xf32> -> vector<192x6xf32>
    %c0_9 = arith.constant 0 : index
    %c0_10 = arith.constant 0 : index
    %7 = vector.load %arg4[%c0_9, %c0_10] : memref<192x75xbf16, #tpu.memory_space<vmem>>, vector<192x75xbf16>
    %cst_11 = arith.constant dense<0.000000e+00> : vector<192x6xf32>
    %8 = tpu.matmul %7, %0, %cst_11 {dimension_numbers = #tpu.dot_dimension_numbers<[1], [0], [0], [1], [0, 0, 1, 1], [], []>} : vector<192x75xbf16>, vector<75x6xbf16>, vector<192x6xf32> -> vector<192x6xf32>
    %9 = arith.maximumf %2, %4 : vector<192x6xf32>
    %10 = arith.maximumf %6, %8 : vector<192x6xf32>
    %11 = arith.maximumf %9, %10 : vector<192x6xf32>
    %c0_12 = arith.constant 0 : index
    %c0_13 = arith.constant 0 : index
    %12 = vector.load %arg6[%c0_12, %c0_13] : memref<1x6xf32, #tpu.memory_space<vmem>>, vector<1x6xf32>
    %13 = vector.broadcast %12 : vector<1x6xf32> to vector<192x6xf32>
    %14 = arith.addf %11, %13 : vector<192x6xf32>
    %cst_14 = arith.constant 0.000000e+00 : f32
    %15 = vector.broadcast %cst_14 : f32 to vector<192x6xf32>
    %16 = arith.maximumf %14, %15 : vector<192x6xf32>
    %17 = arith.truncf %16 : vector<192x6xf32> to vector<192x6xbf16>
    %c0_15 = arith.constant 0 : index
    %c0_16 = arith.constant 0 : index
    %18 = vector.load %arg7[%c0_15, %c0_16] : memref<192x6xbf16, #tpu.memory_space<vmem>>, vector<192x6xbf16>
    tpu.vector_store %arg7[%c0_15, %c0_16], %17 {strides = array<i32>} : memref<192x6xbf16, #tpu.memory_space<vmem>>, vector<192x6xbf16>,
    return
  }
  func.func @transform_0(%arg0: i32) -> (i32, i32) {
    %c0_i32 = arith.constant 0 : i32
    %c0_i32_0 = arith.constant 0 : i32
    return %arg0, %c0_i32 : i32, i32
  }
  func.func @transform_1(%arg0: i32) -> (i32, i32) {
    %c0_i32 = arith.constant 0 : i32
    %c0_i32_0 = arith.constant 0 : i32
    return %arg0, %c0_i32 : i32, i32
  }
  func.func @transform_2(%arg0: i32) -> (i32, i32) {
    %c0_i32 = arith.constant 0 : i32
    %c0_i32_0 = arith.constant 0 : i32
    return %arg0, %c0_i32 : i32, i32
  }
  func.func @transform_3(%arg0: i32) -> (i32, i32) {
    %c0_i32 = arith.constant 0 : i32
    %c0_i32_0 = arith.constant 0 : i32
    return %arg0, %c0_i32 : i32, i32
  }
  func.func @transform_4(%arg0: i32) -> (i32, i32) {
    %c0_i32 = arith.constant 0 : i32
    %c0_i32_0 = arith.constant 0 : i32
    %c0_i32_1 = arith.constant 0 : i32
    return %c0_i32, %c0_i32_0 : i32, i32
  }
  func.func @transform_5(%arg0: i32) -> (i32, i32) {
    %c0_i32 = arith.constant 0 : i32
    %c0_i32_0 = arith.constant 0 : i32
    %c0_i32_1 = arith.constant 0 : i32
    return %c0_i32, %c0_i32_0 : i32, i32
  }
  func.func @transform_6(%arg0: i32) -> (i32, i32) {
    %c0_i32 = arith.constant 0 : i32
    %c0_i32_0 = arith.constant 0 : i32
    return %arg0, %c0_i32 : i32, i32
  }
}

module attributes {stable_mosaic.version = 11 : i64} {
  func.func @_conv_pool_kernel(%arg0: i32, %arg1: memref<16x150xbf16, #tpu.memory_space<vmem>>, %arg2: memref<16x150xbf16, #tpu.memory_space<vmem>>, %arg3: memref<16x150xbf16, #tpu.memory_space<vmem>>, %arg4: memref<16x150xbf16, #tpu.memory_space<vmem>>, %arg5: memref<150x16xbf16, #tpu.memory_space<vmem>>, %arg6: memref<1x16xf32, #tpu.memory_space<vmem>>, %arg7: memref<16x16xbf16, #tpu.memory_space<vmem>>) attributes {dimension_semantics = [#tpu.dimension_semantics<parallel>], iteration_bounds = array<i64: 4>, scalar_prefetch = 0 : i64, scratch_operands = 0 : i64, tpu.core_type = #tpu.core_type<tc>, window_params = [{transform_indices = @transform_0, window_bounds = array<i64: 16, 150>}, {transform_indices = @transform_1, window_bounds = array<i64: 16, 150>}, {transform_indices = @transform_2, window_bounds = array<i64: 16, 150>}, {transform_indices = @transform_3, window_bounds = array<i64: 16, 150>}, {pipeline_mode = #tpu.pipeline_mode<synchronous>, transform_indices = @transform_4, window_bounds = array<i64: 150, 16>}, {pipeline_mode = #tpu.pipeline_mode<synchronous>, transform_indices = @transform_5, window_bounds = array<i64: 1, 16>}, {transform_indices = @transform_6, window_bounds = array<i64: 16, 16>}]} {
    %c0 = arith.constant 0 : index
    %c0_0 = arith.constant 0 : index
    %0 = vector.load %arg5[%c0, %c0_0] : memref<150x16xbf16, #tpu.memory_space<vmem>>, vector<150x16xbf16>
    %c0_1 = arith.constant 0 : index
    %c0_2 = arith.constant 0 : index
    %1 = vector.load %arg1[%c0_1, %c0_2] : memref<16x150xbf16, #tpu.memory_space<vmem>>, vector<16x150xbf16>
    %cst = arith.constant dense<0.000000e+00> : vector<16x16xf32>
    %2 = tpu.matmul %1, %0, %cst {dimension_numbers = #tpu.dot_dimension_numbers<[1], [0], [0], [1], [0, 0, 1, 1], [], []>} : vector<16x150xbf16>, vector<150x16xbf16>, vector<16x16xf32> -> vector<16x16xf32>
    %c0_3 = arith.constant 0 : index
    %c0_4 = arith.constant 0 : index
    %3 = vector.load %arg2[%c0_3, %c0_4] : memref<16x150xbf16, #tpu.memory_space<vmem>>, vector<16x150xbf16>
    %cst_5 = arith.constant dense<0.000000e+00> : vector<16x16xf32>
    %4 = tpu.matmul %3, %0, %cst_5 {dimension_numbers = #tpu.dot_dimension_numbers<[1], [0], [0], [1], [0, 0, 1, 1], [], []>} : vector<16x150xbf16>, vector<150x16xbf16>, vector<16x16xf32> -> vector<16x16xf32>
    %c0_6 = arith.constant 0 : index
    %c0_7 = arith.constant 0 : index
    %5 = vector.load %arg3[%c0_6, %c0_7] : memref<16x150xbf16, #tpu.memory_space<vmem>>, vector<16x150xbf16>
    %cst_8 = arith.constant dense<0.000000e+00> : vector<16x16xf32>
    %6 = tpu.matmul %5, %0, %cst_8 {dimension_numbers = #tpu.dot_dimension_numbers<[1], [0], [0], [1], [0, 0, 1, 1], [], []>} : vector<16x150xbf16>, vector<150x16xbf16>, vector<16x16xf32> -> vector<16x16xf32>
    %c0_9 = arith.constant 0 : index
    %c0_10 = arith.constant 0 : index
    %7 = vector.load %arg4[%c0_9, %c0_10] : memref<16x150xbf16, #tpu.memory_space<vmem>>, vector<16x150xbf16>
    %cst_11 = arith.constant dense<0.000000e+00> : vector<16x16xf32>
    %8 = tpu.matmul %7, %0, %cst_11 {dimension_numbers = #tpu.dot_dimension_numbers<[1], [0], [0], [1], [0, 0, 1, 1], [], []>} : vector<16x150xbf16>, vector<150x16xbf16>, vector<16x16xf32> -> vector<16x16xf32>
    %9 = arith.maximumf %2, %4 : vector<16x16xf32>
    %10 = arith.maximumf %6, %8 : vector<16x16xf32>
    %11 = arith.maximumf %9, %10 : vector<16x16xf32>
    %c0_12 = arith.constant 0 : index
    %c0_13 = arith.constant 0 : index
    %12 = vector.load %arg6[%c0_12, %c0_13] : memref<1x16xf32, #tpu.memory_space<vmem>>, vector<1x16xf32>
    %13 = vector.broadcast %12 : vector<1x16xf32> to vector<16x16xf32>
    %14 = arith.addf %11, %13 : vector<16x16xf32>
    %cst_14 = arith.constant 0.000000e+00 : f32
    %15 = vector.broadcast %cst_14 : f32 to vector<16x16xf32>
    %16 = arith.maximumf %14, %15 : vector<16x16xf32>
    %17 = arith.truncf %16 : vector<16x16xf32> to vector<16x16xbf16>
    %c0_15 = arith.constant 0 : index
    %c0_16 = arith.constant 0 : index
    %18 = vector.load %arg7[%c0_15, %c0_16] : memref<16x16xbf16, #tpu.memory_space<vmem>>, vector<16x16xbf16>
    tpu.vector_store %arg7[%c0_15, %c0_16], %17 {strides = array<i32>} : memref<16x16xbf16, #tpu.memory_space<vmem>>, vector<16x16xbf16>,
    return
  }
  func.func @transform_0(%arg0: i32) -> (i32, i32) {
    %c0_i32 = arith.constant 0 : i32
    %c0_i32_0 = arith.constant 0 : i32
    return %arg0, %c0_i32 : i32, i32
  }
  func.func @transform_1(%arg0: i32) -> (i32, i32) {
    %c0_i32 = arith.constant 0 : i32
    %c0_i32_0 = arith.constant 0 : i32
    return %arg0, %c0_i32 : i32, i32
  }
  func.func @transform_2(%arg0: i32) -> (i32, i32) {
    %c0_i32 = arith.constant 0 : i32
    %c0_i32_0 = arith.constant 0 : i32
    return %arg0, %c0_i32 : i32, i32
  }
  func.func @transform_3(%arg0: i32) -> (i32, i32) {
    %c0_i32 = arith.constant 0 : i32
    %c0_i32_0 = arith.constant 0 : i32
    return %arg0, %c0_i32 : i32, i32
  }
  func.func @transform_4(%arg0: i32) -> (i32, i32) {
    %c0_i32 = arith.constant 0 : i32
    %c0_i32_0 = arith.constant 0 : i32
    %c0_i32_1 = arith.constant 0 : i32
    return %c0_i32, %c0_i32_0 : i32, i32
  }
  func.func @transform_5(%arg0: i32) -> (i32, i32) {
    %c0_i32 = arith.constant 0 : i32
    %c0_i32_0 = arith.constant 0 : i32
    %c0_i32_1 = arith.constant 0 : i32
    return %c0_i32, %c0_i32_0 : i32, i32
  }
  func.func @transform_6(%arg0: i32) -> (i32, i32) {
    %c0_i32 = arith.constant 0 : i32
    %c0_i32_0 = arith.constant 0 : i32
    return %arg0, %c0_i32 : i32, i32
  }
}

module attributes {stable_mosaic.version = 11 : i64} {
  func.func @_mlp_kernel(%arg0: i32, %arg1: memref<2x400xbf16, #tpu.memory_space<vmem>>, %arg2: memref<400x120xbf16, #tpu.memory_space<vmem>>, %arg3: memref<1x120xf32, #tpu.memory_space<vmem>>, %arg4: memref<120x84xbf16, #tpu.memory_space<vmem>>, %arg5: memref<1x84xf32, #tpu.memory_space<vmem>>, %arg6: memref<84x10xbf16, #tpu.memory_space<vmem>>, %arg7: memref<1x10xf32, #tpu.memory_space<vmem>>, %arg8: memref<2x10xf32, #tpu.memory_space<vmem>>) attributes {dimension_semantics = [#tpu.dimension_semantics<parallel>], iteration_bounds = array<i64: 1>, scalar_prefetch = 0 : i64, scratch_operands = 0 : i64, tpu.core_type = #tpu.core_type<tc>, window_params = [{transform_indices = @transform_0, window_bounds = array<i64: 2, 400>}, {pipeline_mode = #tpu.pipeline_mode<synchronous>, transform_indices = @transform_1, window_bounds = array<i64: 400, 120>}, {pipeline_mode = #tpu.pipeline_mode<synchronous>, transform_indices = @transform_2, window_bounds = array<i64: 1, 120>}, {pipeline_mode = #tpu.pipeline_mode<synchronous>, transform_indices = @transform_3, window_bounds = array<i64: 120, 84>}, {pipeline_mode = #tpu.pipeline_mode<synchronous>, transform_indices = @transform_4, window_bounds = array<i64: 1, 84>}, {pipeline_mode = #tpu.pipeline_mode<synchronous>, transform_indices = @transform_5, window_bounds = array<i64: 84, 10>}, {pipeline_mode = #tpu.pipeline_mode<synchronous>, transform_indices = @transform_6, window_bounds = array<i64: 1, 10>}, {transform_indices = @transform_7, window_bounds = array<i64: 2, 10>}]} {
    %c0 = arith.constant 0 : index
    %c0_0 = arith.constant 0 : index
    %0 = vector.load %arg1[%c0, %c0_0] : memref<2x400xbf16, #tpu.memory_space<vmem>>, vector<2x400xbf16>
    %c0_1 = arith.constant 0 : index
    %c0_2 = arith.constant 0 : index
    %1 = vector.load %arg2[%c0_1, %c0_2] : memref<400x120xbf16, #tpu.memory_space<vmem>>, vector<400x120xbf16>
    %cst = arith.constant dense<0.000000e+00> : vector<2x120xf32>
    %2 = tpu.matmul %0, %1, %cst {dimension_numbers = #tpu.dot_dimension_numbers<[1], [0], [0], [1], [0, 0, 1, 1], [], []>} : vector<2x400xbf16>, vector<400x120xbf16>, vector<2x120xf32> -> vector<2x120xf32>
    %c0_3 = arith.constant 0 : index
    %c0_4 = arith.constant 0 : index
    %3 = vector.load %arg3[%c0_3, %c0_4] : memref<1x120xf32, #tpu.memory_space<vmem>>, vector<1x120xf32>
    %4 = vector.broadcast %3 : vector<1x120xf32> to vector<2x120xf32>
    %5 = arith.addf %2, %4 : vector<2x120xf32>
    %cst_5 = arith.constant 0.000000e+00 : f32
    %6 = vector.broadcast %cst_5 : f32 to vector<2x120xf32>
    %7 = arith.maximumf %5, %6 : vector<2x120xf32>
    %8 = arith.truncf %7 : vector<2x120xf32> to vector<2x120xbf16>
    %c0_6 = arith.constant 0 : index
    %c0_7 = arith.constant 0 : index
    %9 = vector.load %arg4[%c0_6, %c0_7] : memref<120x84xbf16, #tpu.memory_space<vmem>>, vector<120x84xbf16>
    %cst_8 = arith.constant dense<0.000000e+00> : vector<2x84xf32>
    %10 = tpu.matmul %8, %9, %cst_8 {dimension_numbers = #tpu.dot_dimension_numbers<[1], [0], [0], [1], [0, 0, 1, 1], [], []>} : vector<2x120xbf16>, vector<120x84xbf16>, vector<2x84xf32> -> vector<2x84xf32>
    %c0_9 = arith.constant 0 : index
    %c0_10 = arith.constant 0 : index
    %11 = vector.load %arg5[%c0_9, %c0_10] : memref<1x84xf32, #tpu.memory_space<vmem>>, vector<1x84xf32>
    %12 = vector.broadcast %11 : vector<1x84xf32> to vector<2x84xf32>
    %13 = arith.addf %10, %12 : vector<2x84xf32>
    %cst_11 = arith.constant 0.000000e+00 : f32
    %14 = vector.broadcast %cst_11 : f32 to vector<2x84xf32>
    %15 = arith.maximumf %13, %14 : vector<2x84xf32>
    %16 = arith.truncf %15 : vector<2x84xf32> to vector<2x84xbf16>
    %c0_12 = arith.constant 0 : index
    %c0_13 = arith.constant 0 : index
    %17 = vector.load %arg6[%c0_12, %c0_13] : memref<84x10xbf16, #tpu.memory_space<vmem>>, vector<84x10xbf16>
    %cst_14 = arith.constant dense<0.000000e+00> : vector<2x10xf32>
    %18 = tpu.matmul %16, %17, %cst_14 {dimension_numbers = #tpu.dot_dimension_numbers<[1], [0], [0], [1], [0, 0, 1, 1], [], []>} : vector<2x84xbf16>, vector<84x10xbf16>, vector<2x10xf32> -> vector<2x10xf32>
    %c0_15 = arith.constant 0 : index
    %c0_16 = arith.constant 0 : index
    %19 = vector.load %arg7[%c0_15, %c0_16] : memref<1x10xf32, #tpu.memory_space<vmem>>, vector<1x10xf32>
    %20 = vector.broadcast %19 : vector<1x10xf32> to vector<2x10xf32>
    %21 = arith.addf %18, %20 : vector<2x10xf32>
    %c0_17 = arith.constant 0 : index
    %c0_18 = arith.constant 0 : index
    %22 = vector.load %arg8[%c0_17, %c0_18] : memref<2x10xf32, #tpu.memory_space<vmem>>, vector<2x10xf32>
    tpu.vector_store %arg8[%c0_17, %c0_18], %21 {strides = array<i32>} : memref<2x10xf32, #tpu.memory_space<vmem>>, vector<2x10xf32>,
    return
  }
  func.func @transform_0(%arg0: i32) -> (i32, i32) {
    %c0_i32 = arith.constant 0 : i32
    %c0_i32_0 = arith.constant 0 : i32
    return %arg0, %c0_i32 : i32, i32
  }
  func.func @transform_1(%arg0: i32) -> (i32, i32) {
    %c0_i32 = arith.constant 0 : i32
    %c0_i32_0 = arith.constant 0 : i32
    %c0_i32_1 = arith.constant 0 : i32
    return %c0_i32, %c0_i32_0 : i32, i32
  }
  func.func @transform_2(%arg0: i32) -> (i32, i32) {
    %c0_i32 = arith.constant 0 : i32
    %c0_i32_0 = arith.constant 0 : i32
    %c0_i32_1 = arith.constant 0 : i32
    return %c0_i32, %c0_i32_0 : i32, i32
  }
  func.func @transform_3(%arg0: i32) -> (i32, i32) {
    %c0_i32 = arith.constant 0 : i32
    %c0_i32_0 = arith.constant 0 : i32
    %c0_i32_1 = arith.constant 0 : i32
    return %c0_i32, %c0_i32_0 : i32, i32
  }
  func.func @transform_4(%arg0: i32) -> (i32, i32) {
    %c0_i32 = arith.constant 0 : i32
    %c0_i32_0 = arith.constant 0 : i32
    %c0_i32_1 = arith.constant 0 : i32
    return %c0_i32, %c0_i32_0 : i32, i32
  }
  func.func @transform_5(%arg0: i32) -> (i32, i32) {
    %c0_i32 = arith.constant 0 : i32
    %c0_i32_0 = arith.constant 0 : i32
    %c0_i32_1 = arith.constant 0 : i32
    return %c0_i32, %c0_i32_0 : i32, i32
  }
  func.func @transform_6(%arg0: i32) -> (i32, i32) {
    %c0_i32 = arith.constant 0 : i32
    %c0_i32_0 = arith.constant 0 : i32
    %c0_i32_1 = arith.constant 0 : i32
    return %c0_i32, %c0_i32_0 : i32, i32
  }
  func.func @transform_7(%arg0: i32) -> (i32, i32) {
    %c0_i32 = arith.constant 0 : i32
    %c0_i32_0 = arith.constant 0 : i32
    return %arg0, %c0_i32 : i32, i32
  }
}

</mosaic_0001>

<bundles_post_ra>
// kernel: net_forward.3
= control target key start
LH: loop header
LB: loop body
LE: loop exit
PB: predicated region body
PF: predicated region fallthrough
CT: control target
= control target key end

     0   :  { %s2684_s21 = smov 0   ;;  %s2686_s22 = smov 0   ;;  %s3184_s0 = inlined_call_operand.vmem [shape: bf16[392,75], index: 0, kind: input, shape index: {}]   ;;  %s3185_s1 = inlined_call_operand.vmem [shape: bf16[392,75], index: 1, kind: input, shape index: {}]   ;;  %s3186_s2 = inlined_call_operand.vmem [shape: bf16[392,75], index: 2, kind: input, shape index: {}]   ;;  %s3187_s3 = inlined_call_operand.vmem [shape: bf16[392,75], index: 3, kind: input, shape index: {}]   ;;  %s3188_s4 = inlined_call_operand.vmem [shape: bf16[75,6], index: 4, kind: input, shape index: {}]   ;;  %s3189_s5 = inlined_call_operand.vmem [shape: f32[1,6], index: 5, kind: input, shape index: {}]   ;;  %s3190_s6 = inlined_call_operand.vmem [shape: bf16[392,6], index: 6, kind: output, shape index: {}]  }
   0x1   :  { %s2688_s23 = smov 0  }
   0x2 LB: > { %s2697_s24 = sadd.s32 4294967295, %s2614_s23   ;;  %s2699_s25 = sadd.s32 1, %s2614_s23   ;;  %s2614_s23 = sphi %s2688_s23, %s3199_s23   ;;  %s2610_s22 = sphi %s2686_s22, %s3198_s22   ;;  %s2606_s21 = sphi %s2684_s21, %s3197_s21  }
   0x3   : > { %s166_s26 = ssub.s32 %s2614_s23, %s2699_s25  ;;  %s169_s27 = sadd.s32 1, %s2610_s22 }
   0x4   : > { %p167_p0 = scmp.eq.s32.totalorder %s166_s26, 0  ;;  %p179_p1 = scmp.ne.s32.totalorder %s2610_s22, %s2606_s21 }
   0x5   : > { %p180_p2 = scmp.eq.s32.totalorder %s2697_s24, 2  ;;  %p2040_p3 = scmp.ge.s32.totalorder %s2614_s23, 1 }
   0x6   : > { %s2707_s28 = scalar_select %p167_p0, %s2610_s22, %s169_s27  }
   0x7   : > { %p2709_p4 = por %p180_p2, %p179_p1  ;;  %p278_p5 = scmp.lt.s32.totalorder %s2614_s23, 4 }
   0x9   : > { %p279_p6 = pnand %p2040_p3, %p278_p5 }
   0xb   : > { %282 = sbr.rel (%p279_p6) target bundleno = 408 (0x198), region = 44 }
  0x10   : > { %v2503_v0 = vld [vmem:[%s3188_s4 + $0x20] sm:$0x3f]   ;;  %vm560_vm0 = vcmask 1044480   ;;  %vm561_vm1 = vcmask 1045504   ;;  %v2648_v1 = vmov 65535   ;;  %v2504_v4 = vld [vmem:[%s3188_s4 + $0x18] sm:$0xff]  }
  0x11   : > { %v562_v2 = vsel %vm560_vm0, 4294967295, %v2648_v1  ;;  %s2720_s10 = smul.u32 24, %s2697_s24  ;;  %v2505_v6 = vld [vmem:[%s3188_s4 + $0x10] sm:$0xff]   ;;  %v2506_v7 = vld [vmem:[%s3188_s4 + $0x8] sm:$0xff]   ;;  %vm523_vm2 = vcmask 613376   ;;  %v2507_v10 = vld [vmem:[%s3188_s4] sm:$0xff]  }
  0x12   : > { %v563_v3 = vsel %vm561_vm1, %v562_v2, 0  ;;  %vm1666_vm3 = vcmask 44032  }
  0x13   : > { %v565_v5 = vand.u32 %v2503_v0, %v563_v3  ;;  %p343_p7 = scmp.lt.s32.totalorder %s2720_s10, 48  ;;  %s1699_s18 = ssub.s32 (%p2709_p4), 49, %s2720_s10 }
  0x14   : > { %p1700_p8 = scmp.lt.s32.totalorder (%p2709_p4), %s1699_s18, 24 }
  0x15   : > { %2276 = vmatprep.subr.bf16.mxu0 %v565_v5  ;;  %2310 = vmatprep.subr.bf16.mxu1 %v565_v5  ;;  %s344_s13 = scalar_select %p343_p7, %s2720_s10, 48 }
  0x16   : > { %2277 = vmatpush3.bf16.msra.mxu0 %v565_v5  ;;  %2311 = vmatpush3.bf16.msra.mxu1 %v565_v5 }
  0x17   : > { %2278 = vmatprep.subr.bf16.mxu0 %v2504_v4  ;;  %2312 = vmatprep.subr.bf16.mxu1 %v2504_v4  ;;  %s2727_s14 = sshll.u32 %s344_s13, 2 }
  0x18   : > { %s2736_s19 = scalar_lea.vmem %s3184_s0, %s2727_s14  ;;  %s2742_s26 = scalar_lea.vmem %s3185_s1, %s2727_s14 }
  0x19   : > { %v2508_v8 = vld [vmem:[%s2736_s19] sm:$0xff]   ;;  %v2510_v11 = vld [vmem:[%s2736_s19 + $0x8] sm:$0xff]   ;;  %v2512_v13 = vld [vmem:[%s2736_s19 + $0x10] sm:$0xff]   ;;  %s2772_s9 = scalar_lea.vmem %s3186_s2, %s2727_s14  ;;  %s2779_s13 = scalar_lea.vmem %s3187_s3, %s2727_s14 }
  0x1a   : > { %2279 = vmatpush3.bf16.msra.mxu0 %v2504_v4  ;;  %2313 = vmatpush3.bf16.msra.mxu1 %v2504_v4  ;;  %v2509_v9 = vld [vmem:[%s2742_s26] sm:$0xff]   ;;  %v2511_v12 = vld [vmem:[%s2742_s26 + $0x8] sm:$0xff]   ;;  %v2513_v14 = vld [vmem:[%s2742_s26 + $0x10] sm:$0xff]   ;;  %s335_s14 = sand.u32 1, %s2606_s21  }
  0x1b   : > { %2280 = vmatprep.subr.bf16.mxu0 %v2505_v6  ;;  %2314 = vmatprep.subr.bf16.mxu1 %v2505_v6  ;;  %v2514_v15 = vld [vmem:[%s2736_s19 + $0x18] sm:$0xff]   ;;  %v2516_v17 = vld [vmem:[%s2736_s19 + $0x20] sm:$0xff]   ;;  %v2518_v19 = vld [vmem:[%s2736_s19 + $0x28] sm:$0xff]   ;;  %s2412_s17 = smul.u32 96, %s335_s14 }
  0x1c   : > { %2286 = vmatprep.mubr.msk.bf16.mxu0 %vm523_vm2, %v2508_v8  ;;  %2320 = vmatprep.mubr.msk.bf16.mxu1 %vm523_vm2, %v2509_v9  ;;  %v2515_v16 = vld [vmem:[%s2742_s26 + $0x18] sm:$0xff]   ;;  %v2517_v18 = vld [vmem:[%s2742_s26 + $0x20] sm:$0xff]   ;;  %v2519_v20 = vld [vmem:[%s2742_s26 + $0x28] sm:$0xff]  }
  0x1d   : > { %v2520_v21 = vld [vmem:[%s2736_s19 + $0x30] sm:$0xff]   ;;  %v2522_v23 = vld [vmem:[%s2736_s19 + $0x38] sm:$0xff]   ;;  %v2524_v25 = vld [vmem:[%s2736_s19 + $0x40] sm:$0xff]   ;;  %s2963_s21 = scalar_lea.vmem [#allocation2], %s2412_s17  }
  0x1e   : > { %2281 = vmatpush3.bf16.msra.mxu0 %v2505_v6  ;;  %2315 = vmatpush3.bf16.msra.mxu1 %v2505_v6  ;;  %v2521_v22 = vld [vmem:[%s2742_s26 + $0x30] sm:$0xff]   ;;  %v2523_v24 = vld [vmem:[%s2742_s26 + $0x38] sm:$0xff]   ;;  %v2525_v26 = vld [vmem:[%s2742_s26 + $0x40] sm:$0xff]  }
  0x1f   : > { %2282 = vmatprep.subr.bf16.mxu0 %v2506_v7  ;;  %2316 = vmatprep.subr.bf16.mxu1 %v2506_v7  ;;  %v2526_v27 = vld [vmem:[%s2736_s19 + $0x48] sm:$0xff]   ;;  %v2528_v29 = vld [vmem:[%s2736_s19 + $0x50] sm:$0xff]   ;;  %v2530_v31 = vld [vmem:[%s2736_s19 + $0x58] sm:$0xff]   ;;  %s2207_s19 = smul.u32 (%p2709_p4), 96, %s2697_s24 }
  0x20   : > { %v2527_v28 = vld [vmem:[%s2742_s26 + $0x48] sm:$0xff]   ;;  %v2529_v30 = vld [vmem:[%s2742_s26 + $0x50] sm:$0xff]   ;;  %v2531_v32 = vld [vmem:[%s2742_s26 + $0x58] sm:$0xff]  }
  0x21   : > { %v2532_v33 = vld [vmem:[%s2772_s9] sm:$0xff]   ;;  %v2534_v35 = vld [vmem:[%s2772_s9 + $0x8] sm:$0xff]   ;;  %v2536_v37 = vld [vmem:[%s2772_s9 + $0x10] sm:$0xff]   ;;  %s3077_s26 = scalar_lea.vmem (%p2709_p4), %s3190_s6, %s2207_s19  }
  0x22   : > { %2283 = vmatpush3.bf16.msra.mxu0 %v2506_v7  ;;  %2317 = vmatpush3.bf16.msra.mxu1 %v2506_v7  ;;  %v2533_v34 = vld [vmem:[%s2779_s13] sm:$0xff]   ;;  %v2535_v36 = vld [vmem:[%s2779_s13 + $0x8] sm:$0xff]   ;;  %v2537_v38 = vld [vmem:[%s2779_s13 + $0x10] sm:$0xff]  }
  0x23   : > { %2284 = vmatprep.subr.bf16.mxu0 %v2507_v10  ;;  %2318 = vmatprep.subr.bf16.mxu1 %v2507_v10  ;;  %v2538_v39 = vld [vmem:[%s2772_s9 + $0x18] sm:$0xff]   ;;  %v2540_v41 = vld [vmem:[%s2772_s9 + $0x20] sm:$0xff]   ;;  %v2542_v43 = vld [vmem:[%s2772_s9 + $0x28] sm:$0xff]  }
  0x24   : > { %v2539_v40 = vld [vmem:[%s2779_s13 + $0x18] sm:$0xff]   ;;  %v2541_v42 = vld [vmem:[%s2779_s13 + $0x20] sm:$0xff]   ;;  %v2543_v44 = vld [vmem:[%s2779_s13 + $0x28] sm:$0xff]  }
  0x25   : > { %v2544_v45 = vld [vmem:[%s2772_s9 + $0x30] sm:$0xff]   ;;  %v2546_v47 = vld [vmem:[%s2772_s9 + $0x38] sm:$0xff]   ;;  %v2548_v49 = vld [vmem:[%s2772_s9 + $0x40] sm:$0xff]  }
  0x26   : > { %2285 = vmatpush3.bf16.msra.mxu0 %v2507_v10  ;;  %2319 = vmatpush3.bf16.msra.mxu1 %v2507_v10  ;;  %v2545_v46 = vld [vmem:[%s2779_s13 + $0x30] sm:$0xff]   ;;  %v2547_v48 = vld [vmem:[%s2779_s13 + $0x38] sm:$0xff]   ;;  %v2549_v50 = vld [vmem:[%s2779_s13 + $0x40] sm:$0xff]  }
  0x27   : > { %2344 = vmatprep.subr.bf16.mxu0 %v565_v5  ;;  %2378 = vmatprep.subr.bf16.mxu1 %v565_v5  ;;  %v2550_v51 = vld [vmem:[%s2772_s9 + $0x48] sm:$0xff]   ;;  %v2552_v53 = vld [vmem:[%s2772_s9 + $0x50] sm:$0xff]   ;;  %v2554_v55 = vld [vmem:[%s2772_s9 + $0x58] sm:$0xff]  }
  0x28   : > { %v2551_v52 = vld [vmem:[%s2779_s13 + $0x48] sm:$0xff]   ;;  %v2553_v54 = vld [vmem:[%s2779_s13 + $0x50] sm:$0xff]   ;;  %v2555_v56 = vld [vmem:[%s2779_s13 + $0x58] sm:$0xff]  }
  0x29   : > { %2287 = vmatmul.mubr.msk.bf16.vlgmr.msra.gmra.mxu0 %vm523_vm2, %v2510_v11  ;;  %2321 = vmatmul.mubr.msk.bf16.vlgmr.msra.gmra.mxu1 %vm523_vm2, %v2511_v12 }
  0x2a   : > { %2345 = vmatpush3.bf16.msra.mxu0 %v565_v5  ;;  %2379 = vmatpush3.bf16.msra.mxu1 %v565_v5 }
  0x2b   : > { %2290 = vmatprep.mubr.msk.bf16.mxu0 %vm523_vm2, %v2512_v13  ;;  %2324 = vmatprep.mubr.msk.bf16.mxu1 %vm523_vm2, %v2513_v14 }
  0x2c   : > { %2346 = vmatprep.subr.bf16.mxu0 %v2504_v4  ;;  %2380 = vmatprep.subr.bf16.mxu1 %v2504_v4 }
  0x2e   : > { %2347 = vmatpush3.bf16.msra.mxu0 %v2504_v4  ;;  %2381 = vmatpush3.bf16.msra.mxu1 %v2504_v4 }
  0x2f   : > { %2348 = vmatprep.subr.bf16.mxu0 %v2505_v6  ;;  %2382 = vmatprep.subr.bf16.mxu1 %v2505_v6 }
  0x31   : > { %2291 = vmatmul.mubr.msk.bf16.gmra.mxu0 %vm523_vm2, %v2514_v15  ;;  %2325 = vmatmul.mubr.msk.bf16.gmra.mxu1 %vm523_vm2, %v2515_v16 }
  0x32   : > { %2294 = vmatprep.mubr.msk.bf16.mxu0 %vm523_vm2, %v2516_v17  ;;  %2328 = vmatprep.mubr.msk.bf16.mxu1 %vm523_vm2, %v2517_v18 }
  0x33   : > { %2349 = vmatpush3.bf16.msra.mxu0 %v2505_v6  ;;  %2383 = vmatpush3.bf16.msra.mxu1 %v2505_v6 }
  0x34   : > { %2350 = vmatprep.subr.bf16.mxu0 %v2506_v7  ;;  %2384 = vmatprep.subr.bf16.mxu1 %v2506_v7 }
  0x37   : > { %2351 = vmatpush3.bf16.msra.mxu0 %v2506_v7  ;;  %2385 = vmatpush3.bf16.msra.mxu1 %v2506_v7 }
  0x38   : > { %2352 = vmatprep.subr.bf16.mxu0 %v2507_v10  ;;  %2386 = vmatprep.subr.bf16.mxu1 %v2507_v10 }
  0x39   : > { %2295 = vmatmul.mubr.msk.bf16.gmra.mxu0 %vm523_vm2, %v2518_v19  ;;  %2329 = vmatmul.mubr.msk.bf16.gmra.mxu1 %vm523_vm2, %v2519_v20 }
  0x3a   : > { %2298 = vmatprep.mubr.msk.bf16.mxu0 %vm523_vm2, %v2520_v21  ;;  %2332 = vmatprep.mubr.msk.bf16.mxu1 %vm523_vm2, %v2521_v22 }
  0x3b   : > { %2353 = vmatpush3.bf16.msra.mxu0 %v2507_v10  ;;  %2387 = vmatpush3.bf16.msra.mxu1 %v2507_v10 }
  0x41   : > { %2299 = vmatmul.mubr.msk.bf16.gmra.mxu0 %vm523_vm2, %v2522_v23  ;;  %2333 = vmatmul.mubr.msk.bf16.gmra.mxu1 %vm523_vm2, %v2523_v24 }
  0x42   : > { %2302 = vmatprep.mubr.msk.bf16.mxu0 %vm523_vm2, %v2524_v25  ;;  %2336 = vmatprep.mubr.msk.bf16.mxu1 %vm523_vm2, %v2525_v26 }
  0x49   : > { %2303 = vmatmul.mubr.msk.bf16.gmra.mxu0 %vm523_vm2, %v2526_v27  ;;  %2337 = vmatmul.mubr.msk.bf16.gmra.mxu1 %vm523_vm2, %v2527_v28 }
  0x4a   : > { %2306 = vmatprep.mubr.msk.bf16.mxu0 %vm523_vm2, %v2528_v29  ;;  %2340 = vmatprep.mubr.msk.bf16.mxu1 %vm523_vm2, %v2529_v30 }
  0x51   : > { %2307 = vmatmul.mubr.msk.bf16.gmra.mxu0 %vm523_vm2, %v2530_v31  ;;  %2341 = vmatmul.mubr.msk.bf16.gmra.mxu1 %vm523_vm2, %v2531_v32 }
  0x52   : > { %2354 = vmatprep.mubr.msk.bf16.mxu0 %vm523_vm2, %v2532_v33  ;;  %2388 = vmatprep.mubr.msk.bf16.mxu1 %vm523_vm2, %v2533_v34 }
  0x59   : > { %2355 = vmatmul.mubr.msk.bf16.vlgmr.msra.gmra.mxu0 %vm523_vm2, %v2534_v35  ;;  %2389 = vmatmul.mubr.msk.bf16.vlgmr.msra.gmra.mxu1 %vm523_vm2, %v2535_v36 }
  0x5a   : > { %2358 = vmatprep.mubr.msk.bf16.mxu0 %vm523_vm2, %v2536_v37  ;;  %2392 = vmatprep.mubr.msk.bf16.mxu1 %vm523_vm2, %v2537_v38 }
  0x61   : > { %2359 = vmatmul.mubr.msk.bf16.gmra.mxu0 %vm523_vm2, %v2538_v39  ;;  %2393 = vmatmul.mubr.msk.bf16.gmra.mxu1 %vm523_vm2, %v2539_v40 }
  0x62   : > { %2362 = vmatprep.mubr.msk.bf16.mxu0 %vm523_vm2, %v2540_v41  ;;  %2396 = vmatprep.mubr.msk.bf16.mxu1 %vm523_vm2, %v2541_v42 }
  0x69   : > { %2363 = vmatmul.mubr.msk.bf16.gmra.mxu0 %vm523_vm2, %v2542_v43  ;;  %2397 = vmatmul.mubr.msk.bf16.gmra.mxu1 %vm523_vm2, %v2543_v44 }
  0x6a   : > { %2366 = vmatprep.mubr.msk.bf16.mxu0 %vm523_vm2, %v2544_v45  ;;  %2400 = vmatprep.mubr.msk.bf16.mxu1 %vm523_vm2, %v2545_v46  ;;  %v2949_v45 = vld [vmem:[%s3189_s5] ss:$0 sm:$0xff] }
  0x71   : > { %2367 = vmatmul.mubr.msk.bf16.gmra.mxu0 %vm523_vm2, %v2546_v47  ;;  %2401 = vmatmul.mubr.msk.bf16.gmra.mxu1 %vm523_vm2, %v2547_v48 }
  0x72   : > { %2370 = vmatprep.mubr.msk.bf16.mxu0 %vm523_vm2, %v2548_v49  ;;  %2404 = vmatprep.mubr.msk.bf16.mxu1 %vm523_vm2, %v2549_v50 }
  0x79   : > { %2371 = vmatmul.mubr.msk.bf16.gmra.mxu0 %vm523_vm2, %v2550_v51  ;;  %2405 = vmatmul.mubr.msk.bf16.gmra.mxu1 %vm523_vm2, %v2551_v52 }
  0x7a   : > { %2374 = vmatprep.mubr.msk.bf16.mxu0 %vm523_vm2, %v2552_v53  ;;  %2408 = vmatprep.mubr.msk.bf16.mxu1 %vm523_vm2, %v2553_v54 }
  0x81   : > { %2375 = vmatmul.mubr.msk.bf16.gmra.mxu0 %vm523_vm2, %v2554_v55  ;;  %2409 = vmatmul.mubr.msk.bf16.gmra.mxu1 %vm523_vm2, %v2555_v56 }
  0xe9   : > { %v2288_v57 = vpop.f32.mrf.mxu0  ;;  %v2322_v58 = vpop.f32.mrf.mxu1 }
  0xea   : > { %v1445_v43 = vmax.f32 %v2288_v57, %v2322_v58 }
  0xeb   : > { %v2855_v59 = vpop.f32.mrf.mxu0  ;;  %v850_v60 = vpop.f32.mrf.mxu1 }
  0xec   : > { %v1443_v48 = vmax.f32 %v2855_v59, %v850_v60 }
  0xed   : > { %v2857_v61 = vpop.f32.mrf.mxu0  ;;  %v2859_v62 = vpop.f32.mrf.mxu1 }
  0xee   : > { %v1446_v53 = vmax.f32 %v2857_v61, %v2859_v62 }
  0xef   : > { %v2861_v63 = vpop.f32.mrf.mxu0  ;;  %v2863_v0 = vpop.f32.mrf.mxu1 }
  0xf0   : > { %v1444_v57 = vmax.f32 %v2861_v63, %v2863_v0 }
  0xf1   : > { %v2865_v1 = vpop.f32.mrf.mxu0  ;;  %v2867_v2 = vpop.f32.mrf.mxu1 }
  0xf3   : > { %v2869_v3 = vpop.f32.mrf.mxu0  ;;  %v2871_v4 = vpop.f32.mrf.mxu1 }
  0xf4   : > { %v1447_v63 = vmax.f32 %v2869_v3, %v2871_v4 }
  0xf5   : > { %v2873_v5 = vpop.f32.mrf.mxu0  ;;  %v2875_v6 = vpop.f32.mrf.mxu1 }
  0xf7   : > { %v2877_v7 = vpop.f32.mrf.mxu0  ;;  %v2879_v8 = vpop.f32.mrf.mxu1 }
  0xf9   : > { %v2881_v9 = vpop.f32.mrf.mxu0  ;;  %v2883_v10 = vpop.f32.mrf.mxu1 }
  0xfb   : > { %v2885_v11 = vpop.f32.mrf.mxu0  ;;  %v2887_v12 = vpop.f32.mrf.mxu1 }
  0xfd   : > { %v2889_v13 = vpop.f32.mrf.mxu0  ;;  %v2891_v14 = vpop.f32.mrf.mxu1 }
  0xff   : > { %v2893_v15 = vpop.f32.mrf.mxu0  ;;  %v2895_v16 = vpop.f32.mrf.mxu1 }
 0x101   : > { %v2897_v17 = vpop.f32.mrf.mxu0  ;;  %v2899_v18 = vpop.f32.mrf.mxu1 }
 0x103   : > { %v2901_v19 = vpop.f32.mrf.mxu0  ;;  %v2903_v20 = vpop.f32.mrf.mxu1 }
 0x105   : > { %v2905_v21 = vpop.f32.mrf.mxu0  ;;  %v2907_v22 = vpop.f32.mrf.mxu1 }
 0x107   : > { %v2909_v23 = vpop.f32.mrf.mxu0  ;;  %v2911_v24 = vpop.f32.mrf.mxu1 }
 0x109   : > { %v2913_v25 = vpop.f32.mrf.mxu0  ;;  %v2915_v26 = vpop.f32.mrf.mxu1 }
 0x10b   : > { %v2917_v27 = vpop.f32.mrf.mxu0  ;;  %v2919_v28 = vpop.f32.mrf.mxu1 }
 0x10d   : > { %v2921_v29 = vpop.f32.mrf.mxu0  ;;  %v2923_v30 = vpop.f32.mrf.mxu1 }
 0x10f   : > { %v2925_v31 = vpop.f32.mrf.mxu0  ;;  %v2927_v32 = vpop.f32.mrf.mxu1 }
 0x111   : > { %v2929_v33 = vpop.f32.mrf.mxu0  ;;  %v2931_v34 = vpop.f32.mrf.mxu1 }
 0x113   : > { %v2933_v35 = vpop.f32.mrf.mxu0  ;;  %v2935_v36 = vpop.f32.mrf.mxu1 }
 0x115   : > { %v2937_v37 = vpop.f32.mrf.mxu0  ;;  %v2939_v38 = vpop.f32.mrf.mxu1 }
 0x117   : > { %v2941_v39 = vpop.f32.mrf.mxu0  ;;  %v2943_v40 = vpop.f32.mrf.mxu1 }
 0x118   : > { %3192 = vst [vmem:[#allocation3_spill] sm:$0xff] %v2941_v39 }
 0x119   : > { %v2356_v41 = vpop.f32.mrf.mxu0  ;;  %v2390_v42 = vpop.f32.mrf.mxu1 }
 0x11a   : > { %v1469_v44 = vmax.f32 %v2356_v41, %v2390_v42 }
 0x11b   : > { %v1099_v46 = vpop.f32.mrf.mxu0  ;;  %v1348_v47 = vpop.f32.mrf.mxu1 }
 0x11c   : > { %v1493_v49 = vmax.f32 %v1445_v43, %v1469_v44  ;;  %v1467_v50 = vmax.f32 %v1099_v46, %v1348_v47 }
 0x11d   : > { %v2357_v51 = vpop.f32.mrf.mxu0  ;;  %v2391_v52 = vpop.f32.mrf.mxu1 }
 0x11e   : > { %v1524_v54 = vadd.f32 %v2949_v45, %v1493_v49  ;;  %v1491_v55 = vmax.f32 %v1443_v48, %v1467_v50  ;;  %v1470_v56 = vmax.f32 %v2357_v51, %v2391_v52  ;;  %v1449_v48 = vmax.f32 %v2865_v1, %v2867_v2 }
 0x11f   : > { %v1102_v58 = vpop.f32.mrf.mxu0  ;;  %v1351_v41 = vpop.f32.mrf.mxu1  ;;  %v1450_v1 = vmax.f32 %v2873_v5, %v2875_v6 }
 0x120   : > { %v1548_v42 = vmax.f32 %v1524_v54, 0.0  ;;  %v1522_v59 = vadd.f32 %v2949_v45, %v1491_v55  ;;  %v1494_v60 = vmax.f32 %v1446_v53, %v1470_v56  ;;  %v1468_v43 = vmax.f32 %v1102_v58, %v1351_v41 }
 0x121   : > { %v2360_v44 = vpop.f32.mrf.mxu0  ;;  %v2394_v46 = vpop.f32.mrf.mxu1 }
 0x122   : > { %v2185_v47 = vpack.c.bf16 %v1548_v42, %v1548_v42  ;;  %v1546_v39 = vmax.f32 %v1522_v59, 0.0  ;;  %v1525_v61 = vadd.f32 %v2949_v45, %v1494_v60  ;;  %v1492_v62 = vmax.f32 %v1444_v57, %v1468_v43 }
 0x123   : > { %v1473_v0 = vmax.f32 %v2360_v44, %v2394_v46  ;;  %v1115_v49 = vpop.f32.mrf.mxu0  ;;  %v1364_v50 = vpop.f32.mrf.mxu1  ;;  %v1453_v44 = vmax.f32 %v2881_v9, %v2883_v10  ;;  %v1451_v10 = vmax.f32 %v2885_v11, %v2887_v12 }
 0x124   : > { %1669 = vst.msk [vmem:[%s2963_s21 + $0x8] sm:$0xf] %vm1666_vm3, %v2185_v47  ;;  %v2183_v51 = vpack.c.bf16 %v1546_v39, %v1546_v39  ;;  %v1549_v52 = vmax.f32 %v1525_v61, 0.0  ;;  %v1523_v53 = vadd.f32 %v2949_v45, %v1492_v62  ;;  %v1471_v54 = vmax.f32 %v1115_v49, %v1364_v50 }
 0x125   : > { %v1497_v2 = vmax.f32 %v1449_v48, %v1473_v0  ;;  %v2361_v3 = vpop.f32.mrf.mxu0  ;;  %v2395_v4 = vpop.f32.mrf.mxu1  ;;  %v1448_v39 = vmax.f32 %v2877_v7, %v2879_v8 }
 0x126   : > { %1667 = vst.msk [vmem:[%s2963_s21] sm:$0xf] %vm1666_vm3, %v2183_v51  ;;  %v2186_v55 = vpack.c.bf16 %v1549_v52, %v1549_v52  ;;  %v1547_v56 = vmax.f32 %v1523_v53, 0.0  ;;  %v1495_v57 = vmax.f32 %v1447_v63, %v1471_v54  ;;  %v1474_v58 = vmax.f32 %v2361_v3, %v2395_v4 }
 0x127   : > { %v1528_v41 = vadd.f32 %v2949_v45, %v1497_v2  ;;  %v1118_v42 = vpop.f32.mrf.mxu0  ;;  %v1367_v59 = vpop.f32.mrf.mxu1  ;;  %v1454_v53 = vmax.f32 %v2889_v13, %v2891_v14 }
 0x128   : > { %1670 = vst.msk [vmem:[%s2963_s21 + $0xc] sm:$0xf] %vm1666_vm3, %v2186_v55  ;;  %v2184_v5 = vpack.c.bf16 %v1547_v56, %v1547_v56  ;;  %v1526_v6 = vadd.f32 %v2949_v45, %v1495_v57  ;;  %v1498_v60 = vmax.f32 %v1450_v1, %v1474_v58  ;;  %v1472_v43 = vmax.f32 %v1118_v42, %v1367_v59 }
 0x129   : > { %v1552_v46 = vmax.f32 %v1528_v41, 0.0  ;;  %v2364_v47 = vpop.f32.mrf.mxu0  ;;  %v2398_v61 = vpop.f32.mrf.mxu1  ;;  %v1452_v57 = vmax.f32 %v2893_v15, %v2895_v16  ;;  %v1457_v42 = vmax.f32 %v2897_v17, %v2899_v18 }
 0x12a   : > { %1668 = vst.msk [vmem:[%s2963_s21 + $0x4] sm:$0xf] %vm1666_vm3, %v2184_v5  ;;  %v1550_v7 = vmax.f32 %v1526_v6, 0.0  ;;  %v1529_v8 = vadd.f32 %v2949_v45, %v1498_v60  ;;  %v1496_v62 = vmax.f32 %v1448_v39, %v1472_v43  ;;  %v1477_v48 = vmax.f32 %v2364_v47, %v2398_v61 }
 0x12b   : > { %v2189_v63 = vpack.c.bf16 %v1552_v46, %v1552_v46  ;;  %v1131_v0 = vpop.f32.mrf.mxu0  ;;  %v1380_v49 = vpop.f32.mrf.mxu1 }
 0x12c   : > { %v2187_v50 = vpack.c.bf16 %v1550_v7, %v1550_v7  ;;  %v1553_v51 = vmax.f32 %v1529_v8, 0.0  ;;  %v1527_v52 = vadd.f32 %v2949_v45, %v1496_v62  ;;  %v1501_v9 = vmax.f32 %v1453_v44, %v1477_v48 }
 0x12d   : > { %1673 = vst.msk [vmem:[%s2963_s21 + $0x18] sm:$0xf] %vm1666_vm3, %v2189_v63  ;;  %v1475_v54 = vmax.f32 %v1131_v0, %v1380_v49  ;;  %v2365_v1 = vpop.f32.mrf.mxu0  ;;  %v2399_v2 = vpop.f32.mrf.mxu1  ;;  %v1455_v44 = vmax.f32 %v2901_v19, %v2903_v20  ;;  %v1458_v20 = vmax.f32 %v2905_v21, %v2907_v22 }
 0x12e   : > { %1671 = vst.msk [vmem:[%s2963_s21 + $0x10] sm:$0xf] %vm1666_vm3, %v2187_v50  ;;  %v2190_v3 = vpack.c.bf16 %v1553_v51, %v1553_v51  ;;  %v1551_v4 = vmax.f32 %v1527_v52, 0.0  ;;  %v1532_v55 = vadd.f32 %v2949_v45, %v1501_v9  ;;  %v1478_v56 = vmax.f32 %v2365_v1, %v2399_v2 }
 0x12f   : > { %v1499_v11 = vmax.f32 %v1451_v10, %v1475_v54  ;;  %v1134_v12 = vpop.f32.mrf.mxu0  ;;  %v1383_v58 = vpop.f32.mrf.mxu1  ;;  %v1456_v51 = vmax.f32 %v2909_v23, %v2911_v24 }
 0x130   : > { %1674 = vst.msk [vmem:[%s2963_s21 + $0x1c] sm:$0xf] %vm1666_vm3, %v2190_v3  ;;  %v2188_v13 = vpack.c.bf16 %v1551_v4, %v1551_v4  ;;  %v1556_v14 = vmax.f32 %v1532_v55, 0.0  ;;  %v1502_v39 = vmax.f32 %v1454_v53, %v1478_v56  ;;  %v1476_v41 = vmax.f32 %v1134_v12, %v1383_v58 }
 0x131   : > { %v1530_v59 = vadd.f32 %v2949_v45, %v1499_v11  ;;  %v2368_v5 = vpop.f32.mrf.mxu0  ;;  %v2402_v6 = vpop.f32.mrf.mxu1  ;;  %v1461_v3 = vmax.f32 %v2913_v25, %v2915_v26 }
 0x132   : > { %1672 = vst.msk [vmem:[%s2963_s21 + $0x14] sm:$0xf] %vm1666_vm3, %v2188_v13  ;;  %v2193_v15 = vpack.c.bf16 %v1556_v14, %v1556_v14  ;;  %v1533_v16 = vadd.f32 %v2949_v45, %v1502_v39  ;;  %v1500_v60 = vmax.f32 %v1452_v57, %v1476_v41  ;;  %v1481_v43 = vmax.f32 %v2368_v5, %v2402_v6 }
 0x133   : > { %v1554_v46 = vmax.f32 %v1530_v59, 0.0  ;;  %v1147_v47 = vpop.f32.mrf.mxu0  ;;  %v1396_v61 = vpop.f32.mrf.mxu1  ;;  %v1459_v57 = vmax.f32 %v2917_v27, %v2919_v28  ;;  %v1462_v39 = vmax.f32 %v2921_v29, %v2923_v30  ;;  %v1460_v30 = vmax.f32 %v2925_v31, %v2927_v32 }
 0x134   : > { %1677 = vst.msk [vmem:[%s2963_s21 + $0x28] sm:$0xf] %vm1666_vm3, %v2193_v15  ;;  %v1557_v17 = vmax.f32 %v1533_v16, 0.0  ;;  %v1531_v18 = vadd.f32 %v2949_v45, %v1500_v60  ;;  %v1505_v7 = vmax.f32 %v1457_v42, %v1481_v43  ;;  %v1479_v8 = vmax.f32 %v1147_v47, %v1396_v61 }
 0x135   : > { %v2191_v62 = vpack.c.bf16 %v1554_v46, %v1554_v46  ;;  %v2369_v48 = vpop.f32.mrf.mxu0  ;;  %v2403_v63 = vpop.f32.mrf.mxu1  ;;  %v1465_v47 = vmax.f32 %v2929_v33, %v2931_v34 }
 0x136   : > { %v2194_v0 = vpack.c.bf16 %v1557_v17, %v1557_v17  ;;  %v1555_v49 = vmax.f32 %v1531_v18, 0.0  ;;  %v1536_v50 = vadd.f32 %v2949_v45, %v1505_v7  ;;  %v1503_v19 = vmax.f32 %v1455_v44, %v1479_v8 }
 0x137   : > { %1675 = vst.msk [vmem:[%s2963_s21 + $0x20] sm:$0xf] %vm1666_vm3, %v2191_v62  ;;  %v1482_v52 = vmax.f32 %v2369_v48, %v2403_v63  ;;  %v1150_v9 = vpop.f32.mrf.mxu0  ;;  %v1399_v10 = vpop.f32.mrf.mxu1  ;;  %v1463_v63 = vmax.f32 %v2933_v35, %v2935_v36 }
 0x138   : > { %1678 = vst.msk [vmem:[%s2963_s21 + $0x2c] sm:$0xf] %vm1666_vm3, %v2194_v0  ;;  %v2192_v53 = vpack.c.bf16 %v1555_v49, %v1555_v49  ;;  %v1560_v54 = vmax.f32 %v1536_v50, 0.0  ;;  %v1534_v1 = vadd.f32 %v2949_v45, %v1503_v19  ;;  %v1480_v2 = vmax.f32 %v1150_v9, %v1399_v10 }
 0x139   : > { %v1506_v21 = vmax.f32 %v1458_v20, %v1482_v52  ;;  %v2372_v22 = vpop.f32.mrf.mxu0  ;;  %v2406_v4 = vpop.f32.mrf.mxu1  ;;  %v1466_v19 = vmax.f32 %v2937_v37, %v2939_v38 }
 0x13a   : > { %1676 = vst.msk [vmem:[%s2963_s21 + $0x24] sm:$0xf] %vm1666_vm3, %v2192_v53  ;;  %v2197_v23 = vpack.c.bf16 %v1560_v54, %v1560_v54  ;;  %v1558_v24 = vmax.f32 %v1534_v1, 0.0  ;;  %v1504_v55 = vmax.f32 %v1456_v51, %v1480_v2  ;;  %v1485_v56 = vmax.f32 %v2372_v22, %v2406_v4  ;;  %v3193_v53 = vld [vmem:[#allocation3_spill] sm:$0xff] }
 0x13b   : > { %v1537_v11 = vadd.f32 %v2949_v45, %v1506_v21  ;;  %v1163_v12 = vpop.f32.mrf.mxu0  ;;  %v1412_v58 = vpop.f32.mrf.mxu1  ;;  %v1464_v54 = vmax.f32 %v3193_v53, %v2943_v40 }
 0x13c   : > { %1681 = vst.msk [vmem:[%s2963_s21 + $0x38] sm:$0xf] %vm1666_vm3, %v2197_v23  ;;  %v2195_v25 = vpack.c.bf16 %v1558_v24, %v1558_v24  ;;  %v1535_v26 = vadd.f32 %v2949_v45, %v1504_v55  ;;  %v1509_v13 = vmax.f32 %v1461_v3, %v1485_v56  ;;  %v1483_v14 = vmax.f32 %v1163_v12, %v1412_v58 }
 0x13d   : > { %v1561_v41 = vmax.f32 %v1537_v11, 0.0  ;;  %v2373_v42 = vpop.f32.mrf.mxu0  ;;  %v2407_v59 = vpop.f32.mrf.mxu1 }
 0x13e   : > { %1679 = vst.msk [vmem:[%s2963_s21 + $0x30] sm:$0xf] %vm1666_vm3, %v2195_v25  ;;  %v1559_v27 = vmax.f32 %v1535_v26, 0.0  ;;  %v1540_v28 = vadd.f32 %v2949_v45, %v1509_v13  ;;  %v1507_v5 = vmax.f32 %v1459_v57, %v1483_v14  ;;  %v1486_v6 = vmax.f32 %v2373_v42, %v2407_v59 }
 0x13f   : > { %v2198_v15 = vpack.c.bf16 %v1561_v41, %v1561_v41  ;;  %v1166_v16 = vpop.f32.mrf.mxu0  ;;  %v1415_v60 = vpop.f32.mrf.mxu1 }
 0x140   : > { %v2196_v43 = vpack.c.bf16 %v1559_v27, %v1559_v27  ;;  %v1564_v44 = vmax.f32 %v1540_v28, 0.0  ;;  %v1538_v46 = vadd.f32 %v2949_v45, %v1507_v5  ;;  %v1510_v29 = vmax.f32 %v1462_v39, %v1486_v6 }
 0x141   : > { %1682 = vst.msk [vmem:[%s2963_s21 + $0x3c] sm:$0xf] %vm1666_vm3, %v2198_v15  ;;  %v1484_v61 = vmax.f32 %v1166_v16, %v1415_v60  ;;  %v2376_v17 = vpop.f32.mrf.mxu0  ;;  %v2410_v18 = vpop.f32.mrf.mxu1 }
 0x142   : > { %1680 = vst.msk [vmem:[%s2963_s21 + $0x34] sm:$0xf] %vm1666_vm3, %v2196_v43  ;;  %v2201_v7 = vpack.c.bf16 %v1564_v44, %v1564_v44  ;;  %v1562_v8 = vmax.f32 %v1538_v46, 0.0  ;;  %v1541_v62 = vadd.f32 %v2949_v45, %v1510_v29  ;;  %v1489_v48 = vmax.f32 %v2376_v17, %v2410_v18 }
 0x143   : > { %v1508_v31 = vmax.f32 %v1460_v30, %v1484_v61  ;;  %v1179_v32 = vpop.f32.mrf.mxu0  ;;  %v1428_v0 = vpop.f32.mrf.mxu1 }
 0x144   : > { %1685 = vst.msk [vmem:[%s2963_s21 + $0x48] sm:$0xf] %vm1666_vm3, %v2201_v7  ;;  %v2199_v33 = vpack.c.bf16 %v1562_v8, %v1562_v8  ;;  %v1565_v34 = vmax.f32 %v1541_v62, 0.0  ;;  %v1513_v49 = vmax.f32 %v1465_v47, %v1489_v48  ;;  %v1487_v50 = vmax.f32 %v1179_v32, %v1428_v0 }
 0x145   : > { %v1539_v20 = vadd.f32 %v2949_v45, %v1508_v31  ;;  %v2377_v51 = vpop.f32.mrf.mxu0  ;;  %v2411_v52 = vpop.f32.mrf.mxu1 }
 0x146   : > { %1683 = vst.msk [vmem:[%s2963_s21 + $0x40] sm:$0xf] %vm1666_vm3, %v2199_v33  ;;  %v2202_v35 = vpack.c.bf16 %v1565_v34, %v1565_v34  ;;  %v1544_v36 = vadd.f32 %v2949_v45, %v1513_v49  ;;  %v1511_v9 = vmax.f32 %v1463_v63, %v1487_v50  ;;  %v1490_v10 = vmax.f32 %v2377_v51, %v2411_v52 }
 0x147   : > { %v1563_v1 = vmax.f32 %v1539_v20, 0.0  ;;  %v1182_v2 = vpop.f32.mrf.mxu0  ;;  %v1431_v3 = vpop.f32.mrf.mxu1 }
 0x148   : > { %1686 = vst.msk [vmem:[%s2963_s21 + $0x4c] sm:$0xf] %vm1666_vm3, %v2202_v35  ;;  %v1568_v37 = vmax.f32 %v1544_v36, 0.0  ;;  %v1542_v38 = vadd.f32 %v2949_v45, %v1511_v9  ;;  %v1514_v21 = vmax.f32 %v1466_v19, %v1490_v10  ;;  %v1488_v22 = vmax.f32 %v1182_v2, %v1431_v3 }
 0x149   : > { %v2200_v4 = vpack.c.bf16 %v1563_v1, %v1563_v1 }
 0x14a   : > { %v2205_v23 = vpack.c.bf16 %v1568_v37, %v1568_v37  ;;  %v1566_v24 = vmax.f32 %v1542_v38, 0.0  ;;  %v1545_v55 = vadd.f32 %v2949_v45, %v1514_v21  ;;  %v1512_v56 = vmax.f32 %v1464_v54, %v1488_v22 }
 0x14b   : > { %1684 = vst.msk [vmem:[%s2963_s21 + $0x44] sm:$0xf] %vm1666_vm3, %v2200_v4 }
 0x14c   : > { %1689 = vst.msk [vmem:[%s2963_s21 + $0x58] sm:$0xf] %vm1666_vm3, %v2205_v23  ;;  %v2203_v40 = vpack.c.bf16 %v1566_v24, %v1566_v24  ;;  %v1569_v57 = vmax.f32 %v1545_v55, 0.0  ;;  %v1543_v11 = vadd.f32 %v2949_v45, %v1512_v56 }
 0x14e   : > { %1687 = vst.msk [vmem:[%s2963_s21 + $0x50] sm:$0xf] %vm1666_vm3, %v2203_v40  ;;  %v2206_v12 = vpack.c.bf16 %v1569_v57, %v1569_v57  ;;  %v1567_v58 = vmax.f32 %v1543_v11, 0.0  ;;  %1697 = sbr.rel (!%p2709_p4) target bundleno = 408 (0x198), region = 48 }
 0x150   : > { %1690 = vst.msk [vmem:[%s2963_s21 + $0x5c] sm:$0xf] %vm1666_vm3, %v2206_v12  ;;  %v2204_v25 = vpack.c.bf16 %v1567_v58, %v1567_v58 }
 0x152   : > { %1688 = vst.msk [vmem:[%s2963_s21 + $0x54] sm:$0xf] %vm1666_vm3, %v2204_v25 }
 0x153   : > { %s3201_s18 = smov (!%p1700_p8, %s1699_s18), 24 }
 0x154   : > { %s2171_s27 = sshll.u32 %s3201_s18, 6 }
 0x155   : > { %p2174_p9 = scmp.eq.s32.totalorder %s2171_s27, 0 }
 0x156   : > { %2556 = sdivrem.u32 (!%p2174_p9), %s3201_s18, 24 }
 0x157   : > { %1708 = sbr.rel (%p2174_p9) target bundleno = 408 (0x198), region = 52 }
 0x15f   : > { %s3083_s29 = spop.drf %2556 }
 0x160   : > { %p2175_p10 = scmp.le.s32.totalorder %s3083_s29, 0 }
 0x161   : > { %s3194_s24 = smov (!%p2175_p10), %s3077_s26  ;;  %s3195_s10 = smov (!%p2175_p10), %s2963_s21 }
 0x162   : > { %1975 = sbr.rel (%p2175_p10) target bundleno = 383 (0x17f), region = 133  ;;  %s3092_s30 = smov (!%p2175_p10), 0  }
 0x163   : > { %s3094_s7 = smov (!%p2175_p10), 0  }
 0x167 LB: >> { %v1726_v45 = vld [vmem:[%s2622_s10] sm:$0xf]  ;;  %v1728_v26 = vld [vmem:[%s2622_s10 + $0x4] sm:$0xf]  ;;  %v1730_v13 = vld [vmem:[%s2622_s10 + $0x8] sm:$0xf]  ;;  %s2630_s7 = sphi %s3094_s7, %s1720_s7   ;;  %s2626_s30 = sphi %s3092_s30, %s3196_s30   ;;  %s2622_s10 = sphi %s3195_s10, %s1779_s10   ;;  %s2618_s24 = sphi %s3194_s24, %s1780_s24  }
 0x168   : >> { %1727 = vst [vmem:[%s2618_s24] sm:$0xf] %v1726_v45  ;;  %1729 = vst [vmem:[%s2618_s24 + $0x4] sm:$0xf] %v1728_v26  ;;  %v1732_v14 = vld [vmem:[%s2622_s10 + $0xc] sm:$0xf]  ;;  %s1774_s8 = sadd.s32 1, %s2626_s30 }
 0x169   : >> { %1731 = vst [vmem:[%s2618_s24 + $0x8] sm:$0xf] %v1730_v13  ;;  %v1734_v39 = vld [vmem:[%s2622_s10 + $0x10] sm:$0xf]  ;;  %v1736_v41 = vld [vmem:[%s2622_s10 + $0x14] sm:$0xf]  ;;  %p1775_p11 = scmp.ge.s32.totalorder %s1774_s8, %s3083_s29 }
 0x16a   : >> { %1733 = vst [vmem:[%s2618_s24 + $0xc] sm:$0xf] %v1732_v14  ;;  %1735 = vst [vmem:[%s2618_s24 + $0x10] sm:$0xf] %v1734_v39  ;;  %v1738_v42 = vld [vmem:[%s2622_s10 + $0x18] sm:$0xf] }
 0x16b   : >> { %1737 = vst [vmem:[%s2618_s24 + $0x14] sm:$0xf] %v1736_v41  ;;  %v1740_v59 = vld [vmem:[%s2622_s10 + $0x1c] sm:$0xf]  ;;  %v1742_v27 = vld [vmem:[%s2622_s10 + $0x20] sm:$0xf] }
 0x16c   : >> { %1739 = vst [vmem:[%s2618_s24 + $0x18] sm:$0xf] %v1738_v42  ;;  %1741 = vst [vmem:[%s2618_s24 + $0x1c] sm:$0xf] %v1740_v59  ;;  %v1744_v28 = vld [vmem:[%s2622_s10 + $0x24] sm:$0xf] }
 0x16d   : >> { %1743 = vst [vmem:[%s2618_s24 + $0x20] sm:$0xf] %v1742_v27  ;;  %v1746_v5 = vld [vmem:[%s2622_s10 + $0x28] sm:$0xf]  ;;  %v1748_v6 = vld [vmem:[%s2622_s10 + $0x2c] sm:$0xf] }
 0x16e   : >> { %1745 = vst [vmem:[%s2618_s24 + $0x24] sm:$0xf] %v1744_v28  ;;  %1747 = vst [vmem:[%s2618_s24 + $0x28] sm:$0xf] %v1746_v5  ;;  %v1750_v15 = vld [vmem:[%s2622_s10 + $0x30] sm:$0xf] }
 0x16f   : >> { %1749 = vst [vmem:[%s2618_s24 + $0x2c] sm:$0xf] %v1748_v6  ;;  %v1752_v16 = vld [vmem:[%s2622_s10 + $0x34] sm:$0xf]  ;;  %v1754_v60 = vld [vmem:[%s2622_s10 + $0x38] sm:$0xf] }
 0x170   : >> { %1751 = vst [vmem:[%s2618_s24 + $0x30] sm:$0xf] %v1750_v15  ;;  %1753 = vst [vmem:[%s2618_s24 + $0x34] sm:$0xf] %v1752_v16  ;;  %v1756_v43 = vld [vmem:[%s2622_s10 + $0x3c] sm:$0xf] }
 0x171   : >> { %1755 = vst [vmem:[%s2618_s24 + $0x38] sm:$0xf] %v1754_v60  ;;  %v1758_v44 = vld [vmem:[%s2622_s10 + $0x40] sm:$0xf]  ;;  %v1760_v46 = vld [vmem:[%s2622_s10 + $0x44] sm:$0xf] }
 0x172   : >> { %1757 = vst [vmem:[%s2618_s24 + $0x3c] sm:$0xf] %v1756_v43  ;;  %1759 = vst [vmem:[%s2618_s24 + $0x40] sm:$0xf] %v1758_v44  ;;  %v1762_v29 = vld [vmem:[%s2622_s10 + $0x48] sm:$0xf] }
 0x173   : >> { %1761 = vst [vmem:[%s2618_s24 + $0x44] sm:$0xf] %v1760_v46  ;;  %v1764_v30 = vld [vmem:[%s2622_s10 + $0x4c] sm:$0xf]  ;;  %v1766_v47 = vld [vmem:[%s2622_s10 + $0x50] sm:$0xf] }
 0x174   : >> { %1763 = vst [vmem:[%s2618_s24 + $0x48] sm:$0xf] %v1762_v29  ;;  %1765 = vst [vmem:[%s2618_s24 + $0x4c] sm:$0xf] %v1764_v30  ;;  %v1768_v61 = vld [vmem:[%s2622_s10 + $0x54] sm:$0xf] }
 0x175   : >> { %1767 = vst [vmem:[%s2618_s24 + $0x50] sm:$0xf] %v1766_v47  ;;  %v1770_v17 = vld [vmem:[%s2622_s10 + $0x58] sm:$0xf]  ;;  %v1772_v18 = vld [vmem:[%s2622_s10 + $0x5c] sm:$0xf] }
 0x176   : >> { %1769 = vst [vmem:[%s2618_s24 + $0x54] sm:$0xf] %v1768_v61  ;;  %1771 = vst [vmem:[%s2618_s24 + $0x58] sm:$0xf] %v1770_v17  ;;  %s3203_s8 = smov (%p1775_p11, %s1774_s8), 0  ;;  %s1720_s7 = sadd.s32 1, %s2630_s7  }
 0x177   : >> { %1773 = vst [vmem:[%s2618_s24 + $0x5c] sm:$0xf] %v1772_v18  ;;  %s1777_s9 = smul.u32 96, %s3203_s8  ;;  %p1719_p12 = scmp.ge.s32.totalorder %s1720_s7, %s3083_s29 }
 0x178   : >> { %s3196_s30 = smov %s3203_s8 }
 0x179   : >> { %s1779_s10 = scalar_lea.vmem %s2963_s21, %s1777_s9 [#allocation2]   ;;  %s1780_s24 = scalar_lea.vmem %s3077_s26, %s1777_s9  }
 0x17a   : > { %1722 = sbr.rel (!%p1719_p12) target bundleno = 359 (0x167), region = 139 }
 0x17f PF: > { %2558 = sdivrem.u32 %s3201_s18, 24 }
 0x180   : > { %s2176_s11 = smul.u32 96, %s3083_s29 }
 0x182   : > { %s1785_s12 = scalar_lea.vmem %s2963_s21, %s2176_s11 [#allocation2]   ;;  %s1787_s13 = scalar_lea.vmem %s3077_s26, %s2176_s11  }
 0x188   : > { %s2559_s14 = spop.drf %2558 }
 0x189   : > { %p2178_p13 = scmp.le.s32.totalorder %s2559_s14, 0 }
 0x18a   : > { %s2632_s15 = smov (!%p2178_p13), %s1787_s13   ;;  %s2636_s16 = smov (!%p2178_p13), %s1785_s12  }
 0x18b   : > { %1989 = sbr.rel (%p2178_p13) target bundleno = 408 (0x198), region = 144  ;;  %s2640_s17 = smov (!%p2178_p13), 0  }
 0x18c   : > { %s2644_s19 = smov (!%p2178_p13), 0  }
 0x190 LB: >> { %v1797_v7 = vld [vmem:[%s2638_s16] sm:$0xf]  ;;  %s1799_s20 = sadd.s32 1, %s2642_s17  ;;  %s1791_s19 = sadd.s32 1, %s2646_s19   ;;  %s2646_s19 = sphi %s2644_s19, %s1791_s19   ;;  %s2642_s17 = sphi %s2640_s17, %s2641_s17   ;;  %s2638_s16 = sphi %s2636_s16, %s1804_s16   ;;  %s2634_s15 = sphi %s2632_s15, %s1805_s15  }
 0x191   : >> { %1798 = vst [vmem:[%s2634_s15] sm:$0xf] %v1797_v7  ;;  %p1800_p0 = scmp.ge.s32.totalorder %s1799_s20, %s2559_s14  ;;  %p1790_p1 = scmp.ge.s32.totalorder %s1791_s19, %s2559_s14 }
 0x193   : >> { %s3205_s20 = smov (%p1800_p0, %s1799_s20), 0  ;;  %1793 = sbr.rel (!%p1790_p1) target bundleno = 400 (0x190), region = 150 }
 0x194   : >> { %s2179_s21 = sshll.u32 %s3205_s20, 2  ;;  %s2641_s17 = smov %s3205_s20  }
 0x195   : >> { %s1804_s16 = scalar_lea.vmem %s1785_s12, %s2179_s21 [#allocation2]   ;;  %s1805_s15 = scalar_lea.vmem %s1787_s13, %s2179_s21  }
 0x198 PF: > { %p13_p2 = scmp.ge.s32.totalorder %s2699_s25, 5   ;;  %s3197_s21 = smov %s2610_s22 }
 0x199   : > { %s3198_s22 = smov %s2707_s28  ;;  %s3199_s23 = smov %s2699_s25 }
 0x19a   :  { %15 = sbr.rel (!%p13_p2) target bundleno = 2 (0x2), region = 161 }

// kernel: net_forward.4
= control target key start
LH: loop header
LB: loop body
LE: loop exit
PB: predicated region body
PF: predicated region fallthrough
CT: control target
= control target key end

     0   :  { %s1320_s21 = smov 0   ;;  %s1322_s22 = smov 0   ;;  %s1529_s0 = inlined_call_operand.vmem [shape: bf16[50,150], index: 0, kind: input, shape index: {}]   ;;  %s1530_s1 = inlined_call_operand.vmem [shape: bf16[50,150], index: 1, kind: input, shape index: {}]   ;;  %s1531_s2 = inlined_call_operand.vmem [shape: bf16[50,150], index: 2, kind: input, shape index: {}]   ;;  %s1532_s3 = inlined_call_operand.vmem [shape: bf16[50,150], index: 3, kind: input, shape index: {}]   ;;  %s1533_s4 = inlined_call_operand.vmem [shape: bf16[150,16], index: 4, kind: input, shape index: {}]   ;;  %s1534_s5 = inlined_call_operand.vmem [shape: f32[1,16], index: 5, kind: input, shape index: {}]   ;;  %s1535_s6 = inlined_call_operand.vmem [shape: bf16[50,16], index: 6, kind: output, shape index: {}]  }
   0x1   :  { %s1324_s23 = smov 0  }
   0x2 LB: > { %s1333_s24 = sadd.s32 4294967295, %s1250_s23   ;;  %s1335_s25 = sadd.s32 1, %s1250_s23   ;;  %s1250_s23 = sphi %s1324_s23, %s1539_s23   ;;  %s1246_s22 = sphi %s1322_s22, %s1538_s22   ;;  %s1242_s21 = sphi %s1320_s21, %s1537_s21  }
   0x3   : > { %s166_s26 = ssub.s32 %s1250_s23, %s1335_s25  ;;  %s169_s27 = sadd.s32 1, %s1246_s22 }
   0x4   : > { %p167_p0 = scmp.eq.s32.totalorder %s166_s26, 0  ;;  %p179_p1 = scmp.ne.s32.totalorder %s1246_s22, %s1242_s21 }
   0x5   : > { %p180_p2 = scmp.eq.s32.totalorder %s1333_s24, 3  ;;  %p1020_p3 = scmp.ge.s32.totalorder %s1250_s23, 1 }
   0x6   : > { %s1343_s28 = scalar_select %p167_p0, %s1246_s22, %s169_s27  }
   0x7   : > { %p1345_p4 = por %p180_p2, %p179_p1  ;;  %p290_p5 = scmp.lt.s32.totalorder %s1250_s23, 5 }
   0x9   : > { %p291_p6 = pnand %p1020_p3, %p290_p5 }
   0xa   : > { %s1364_s10 = sshll.u32 (!%p291_p6), %s1333_s24, 1 }
   0xb   : > { %294 = sbr.rel (%p291_p6) target bundleno = 344 (0x158), region = 44  ;;  %p364_p7 = scmp.lt.s32.totalorder (!%p291_p6), %s1364_s10, 6 }
  0x10   : > { %v1352_v0 = vld [vmem:[%s1533_s4 + $0x38] sm:$0xff]   ;;  %v1284_v1 = vmov 0   ;;  %v1361_v2 = vld [vmem:[%s1533_s4 + $0x30] sm:$0xff]   ;;  %s365_s11 = scalar_select %p364_p7, %s1364_s10, 6  ;;  %v1375_v3 = vld [vmem:[%s1533_s4 + $0x28] sm:$0xff]   ;;  %vm519_vm0 = vcmask 179200  }
  0x11   : > { %527 = vmatprep.subr.bf16.mxu0 %v1284_v1  ;;  %582 = vmatprep.subr.bf16.mxu1 %v1284_v1  ;;  %v1394_v4 = vld [vmem:[%s1533_s4 + $0x20] sm:$0xff]   ;;  %v1178_v7 = vld [vmem:[%s1533_s4 + $0x18] sm:$0xff]   ;;  %v1179_v8 = vld [vmem:[%s1533_s4 + $0x10] sm:$0xff]   ;;  %vm523_vm1 = vcmask 1042432   ;;  %vm758_vm2 = vcmask 125952   ;;  %s1082_s12 = sshll.u32 (%p1345_p4), %s1333_s24, 3 }
  0x12   : > { %528 = vmatpush1.bf16.msra.mxu0 %v1352_v0  ;;  %583 = vmatpush1.bf16.msra.mxu1 %v1352_v0  ;;  %s1076_s14 = sshll.u32 %s365_s11, 3  ;;  %v1180_v9 = vld [vmem:[%s1533_s4 + $0x8] sm:$0xff]   ;;  %v1181_v10 = vld [vmem:[%s1533_s4] sm:$0xff]   ;;  %s1495_s16 = scalar_lea.vmem (%p1345_p4), %s1535_s6, %s1082_s12  }
  0x13   : > { %529 = vmatprep.subr.bf16.mxu0 %v1284_v1  ;;  %584 = vmatprep.subr.bf16.mxu1 %v1284_v1  ;;  %s1382_s17 = scalar_lea.vmem %s1529_s0, %s1076_s14  ;;  %s1387_s20 = scalar_lea.vmem %s1530_s1, %s1076_s14  ;;  %v1182_v11 = vld [vmem:[%s1533_s4 + $0x48] ss:$0 sps:$4 sm:$0x77]   ;;  %v1183_v13 = vld [vmem:[%s1533_s4 + $0x40] sm:$0xff]  }
  0x14   : > { %v1186_v5 = vld [vmem:[%s1382_s17 + $0x4] ss:$8 sps:$4 sm:$0xff]   ;;  %s1402_s7 = scalar_lea.vmem %s1531_s2, %s1076_s14  ;;  %s1409_s11 = scalar_lea.vmem %s1532_s3, %s1076_s14  ;;  %v525_v12 = vsel %vm523_vm1, %v1182_v11, 0  ;;  %v1184_v14 = vld [vmem:[%s1382_s17] ss:$8 sps:$4 sm:$0xff]  }
  0x15   : > { %1046 = vmatprep.mubr.msk.bf16.mxu0 %vm519_vm0, %v1186_v5  ;;  %v1189_v6 = vld [vmem:[%s1387_s20 + $0x4] ss:$8 sps:$4 sm:$0xff]   ;;  %v1187_v15 = vld [vmem:[%s1387_s20] ss:$8 sps:$4 sm:$0xff]   ;;  %s355_s17 = sand.u32 1, %s1242_s21  }
  0x16   : > { %530 = vmatpush1.bf16.msra.mxu0 %v1361_v2  ;;  %585 = vmatpush1.bf16.msra.mxu1 %v1361_v2  ;;  %v1190_v16 = vld [vmem:[%s1402_s7 + $0x4] ss:$8 sps:$4 sm:$0xff]   ;;  %v1194_v18 = vld [vmem:[%s1402_s7] ss:$8 sps:$4 sm:$0xff]   ;;  %s1021_s9 = sshll.u32 %s355_s17, 3 }
  0x17   : > { %531 = vmatprep.subr.bf16.mxu0 %v1284_v1  ;;  %586 = vmatprep.subr.bf16.mxu1 %v1284_v1  ;;  %v1192_v17 = vld [vmem:[%s1409_s11 + $0x4] ss:$8 sps:$4 sm:$0xff]   ;;  %v1195_v19 = vld [vmem:[%s1409_s11] ss:$8 sps:$4 sm:$0xff]   ;;  %s1484_s21 = scalar_lea.vmem [#allocation2], %s1021_s9   ;;  %s769_s11 = ssub.s32 (%p1345_p4), 7, %s1364_s10 }
  0x18   : > { %1049 = vmatprep.mubr.msk.bf16.mxu1 %vm519_vm0, %v1189_v6  ;;  %v1056_v32 = vld [vmem:[%s1534_s5] ss:$0 sm:$0xff]  ;;  %p770_p8 = scmp.lt.s32.totalorder (%p1345_p4), %s769_s11, 2 }
  0x1a   : > { %532 = vmatpush1.bf16.msra.mxu0 %v1375_v3  ;;  %587 = vmatpush1.bf16.msra.mxu1 %v1375_v3 }
  0x1b   : > { %533 = vmatprep.subr.bf16.mxu0 %v1284_v1  ;;  %588 = vmatprep.subr.bf16.mxu1 %v1284_v1 }
  0x1e   : > { %534 = vmatpush1.bf16.msra.mxu0 %v1394_v4  ;;  %589 = vmatpush1.bf16.msra.mxu1 %v1394_v4 }
  0x1f   : > { %535 = vmatprep.subr.bf16.mxu0 %v1284_v1  ;;  %590 = vmatprep.subr.bf16.mxu1 %v1284_v1 }
  0x22   : > { %536 = vmatpush1.bf16.msra.mxu0 %v1178_v7  ;;  %591 = vmatpush1.bf16.msra.mxu1 %v1178_v7 }
  0x23   : > { %537 = vmatprep.subr.bf16.mxu0 %v1284_v1  ;;  %592 = vmatprep.subr.bf16.mxu1 %v1284_v1 }
  0x26   : > { %538 = vmatpush1.bf16.msra.mxu0 %v1179_v8  ;;  %593 = vmatpush1.bf16.msra.mxu1 %v1179_v8 }
  0x27   : > { %539 = vmatprep.subr.bf16.mxu0 %v1284_v1  ;;  %594 = vmatprep.subr.bf16.mxu1 %v1284_v1 }
  0x2a   : > { %540 = vmatpush1.bf16.msra.mxu0 %v1180_v9  ;;  %595 = vmatpush1.bf16.msra.mxu1 %v1180_v9 }
  0x2b   : > { %541 = vmatprep.subr.bf16.mxu0 %v1284_v1  ;;  %596 = vmatprep.subr.bf16.mxu1 %v1284_v1 }
  0x2e   : > { %542 = vmatpush1.bf16.msra.mxu0 %v1181_v10  ;;  %597 = vmatpush1.bf16.msra.mxu1 %v1181_v10 }
  0x2f   : > { %555 = vmatprep.subr.bf16.mxu0 %v1284_v1  ;;  %610 = vmatprep.subr.bf16.mxu1 %v1284_v1 }
  0x32   : > { %556 = vmatpush2.bf16.msra.mxu0 %v525_v12  ;;  %611 = vmatpush2.bf16.msra.mxu1 %v525_v12 }
  0x33   : > { %557 = vmatprep.subr.bf16.mxu0 %v1284_v1  ;;  %612 = vmatprep.subr.bf16.mxu1 %v1284_v1 }
  0x36   : > { %558 = vmatpush2.bf16.msra.mxu0 %v1183_v13  ;;  %613 = vmatpush2.bf16.msra.mxu1 %v1183_v13 }
  0x37   : > { %637 = vmatprep.subr.bf16.mxu0 %v1284_v1  ;;  %692 = vmatprep.subr.bf16.mxu1 %v1284_v1 }
  0x39   : > { %560 = vmatmul.mubr.bf16.vlgmr.msra.gmra.mxu0 %v1184_v14  ;;  %615 = vmatmul.mubr.bf16.vlgmr.msra.gmra.mxu1 %v1187_v15 }
  0x3a   : > { %638 = vmatpush1.bf16.msra.mxu0 %v1352_v0  ;;  %693 = vmatpush1.bf16.msra.mxu1 %v1352_v0 }
  0x3b   : > { %639 = vmatprep.subr.bf16.mxu0 %v1284_v1  ;;  %694 = vmatprep.subr.bf16.mxu1 %v1284_v1 }
  0x3c   : > { %1052 = vmatprep.mubr.msk.bf16.mxu0 %vm519_vm0, %v1190_v16  ;;  %1055 = vmatprep.mubr.msk.bf16.mxu1 %vm519_vm0, %v1192_v17 }
  0x3e   : > { %640 = vmatpush1.bf16.msra.mxu0 %v1361_v2  ;;  %695 = vmatpush1.bf16.msra.mxu1 %v1361_v2 }
  0x3f   : > { %641 = vmatprep.subr.bf16.mxu0 %v1284_v1  ;;  %696 = vmatprep.subr.bf16.mxu1 %v1284_v1 }
  0x42   : > { %642 = vmatpush1.bf16.msra.mxu0 %v1375_v3  ;;  %697 = vmatpush1.bf16.msra.mxu1 %v1375_v3 }
  0x43   : > { %643 = vmatprep.subr.bf16.mxu0 %v1284_v1  ;;  %698 = vmatprep.subr.bf16.mxu1 %v1284_v1 }
  0x46   : > { %644 = vmatpush1.bf16.msra.mxu0 %v1394_v4  ;;  %699 = vmatpush1.bf16.msra.mxu1 %v1394_v4 }
  0x47   : > { %645 = vmatprep.subr.bf16.mxu0 %v1284_v1  ;;  %700 = vmatprep.subr.bf16.mxu1 %v1284_v1 }
  0x4a   : > { %646 = vmatpush1.bf16.msra.mxu0 %v1178_v7  ;;  %701 = vmatpush1.bf16.msra.mxu1 %v1178_v7 }
  0x4b   : > { %647 = vmatprep.subr.bf16.mxu0 %v1284_v1  ;;  %702 = vmatprep.subr.bf16.mxu1 %v1284_v1 }
  0x4e   : > { %648 = vmatpush1.bf16.msra.mxu0 %v1179_v8  ;;  %703 = vmatpush1.bf16.msra.mxu1 %v1179_v8 }
  0x4f   : > { %649 = vmatprep.subr.bf16.mxu0 %v1284_v1  ;;  %704 = vmatprep.subr.bf16.mxu1 %v1284_v1 }
  0x52   : > { %650 = vmatpush1.bf16.msra.mxu0 %v1180_v9  ;;  %705 = vmatpush1.bf16.msra.mxu1 %v1180_v9 }
  0x53   : > { %651 = vmatprep.subr.bf16.mxu0 %v1284_v1  ;;  %706 = vmatprep.subr.bf16.mxu1 %v1284_v1 }
  0x56   : > { %652 = vmatpush1.bf16.msra.mxu0 %v1181_v10  ;;  %707 = vmatpush1.bf16.msra.mxu1 %v1181_v10 }
  0x57   : > { %665 = vmatprep.subr.bf16.mxu0 %v1284_v1  ;;  %720 = vmatprep.subr.bf16.mxu1 %v1284_v1 }
  0x5a   : > { %666 = vmatpush2.bf16.msra.mxu0 %v525_v12  ;;  %721 = vmatpush2.bf16.msra.mxu1 %v525_v12 }
  0x5b   : > { %667 = vmatprep.subr.bf16.mxu0 %v1284_v1  ;;  %722 = vmatprep.subr.bf16.mxu1 %v1284_v1 }
  0x5e   : > { %668 = vmatpush2.bf16.msra.mxu0 %v1183_v13  ;;  %723 = vmatpush2.bf16.msra.mxu1 %v1183_v13 }
  0x61   : > { %670 = vmatmul.mubr.bf16.vlgmr.msra.gmra.mxu0 %v1194_v18  ;;  %725 = vmatmul.mubr.bf16.vlgmr.msra.gmra.mxu1 %v1195_v19 }
  0xf9   : > { %v561_v20 = vpop.f32.mrf.mxu0  ;;  %v616_v21 = vpop.f32.mrf.mxu1 }
  0xfa   : > { %v733_v30 = vmax.f32 %v561_v20, %v616_v21 }
  0xfb   : > { %v563_v22 = vpop.f32.mrf.mxu0  ;;  %v618_v23 = vpop.f32.mrf.mxu1 }
  0xfd   : > { %v564_v24 = vpop.f32.mrf.mxu0  ;;  %v619_v25 = vpop.f32.mrf.mxu1 }
  0xfe   : > { %v734_v38 = vmax.f32 %v564_v24, %v619_v25 }
  0xff   : > { %v566_v26 = vpop.f32.mrf.mxu0  ;;  %v621_v27 = vpop.f32.mrf.mxu1 }
 0x121   : > { %v671_v28 = vpop.f32.mrf.mxu0  ;;  %v726_v29 = vpop.f32.mrf.mxu1 }
 0x122   : > { %v735_v31 = vmax.f32 %v671_v28, %v726_v29 }
 0x123   : > { %v673_v33 = vpop.f32.mrf.mxu0  ;;  %v728_v34 = vpop.f32.mrf.mxu1 }
 0x124   : > { %v737_v35 = vmax.f32 %v733_v30, %v735_v31 }
 0x125   : > { %v674_v36 = vpop.f32.mrf.mxu0  ;;  %v729_v37 = vpop.f32.mrf.mxu1 }
 0x126   : > { %v746_v39 = vadd.f32 %v1056_v32, %v737_v35  ;;  %v736_v40 = vmax.f32 %v674_v36, %v729_v37 }
 0x127   : > { %v676_v41 = vpop.f32.mrf.mxu0  ;;  %v731_v42 = vpop.f32.mrf.mxu1 }
 0x128   : > { %v748_v43 = vmax.f32 %v746_v39, 0.0  ;;  %v738_v44 = vmax.f32 %v734_v38, %v736_v40 }
 0x12a   : > { %v1080_v45 = vpack.c.bf16 %v748_v43, %v748_v43  ;;  %v747_v46 = vadd.f32 %v1056_v32, %v738_v44 }
 0x12c   : > { %759 = vst.msk [vmem:[%s1484_s21] sm:$0xf] %vm758_vm2, %v1080_v45  ;;  %v749_v47 = vmax.f32 %v747_v46, 0.0  ;;  %767 = sbr.rel (!%p1345_p4) target bundleno = 344 (0x158), region = 48 }
 0x12e   : > { %v1081_v48 = vpack.c.bf16 %v749_v47, %v749_v47 }
 0x130   : > { %760 = vst.msk [vmem:[%s1484_s21 + $0x4] sm:$0xf] %vm758_vm2, %v1081_v48 }
 0x131   : > { %s1541_s11 = smov (!%p770_p8, %s769_s11), 2 }
 0x132   : > { %s1061_s14 = sshll.u32 %s1541_s11, 6 }
 0x133   : > { %p1064_p9 = scmp.eq.s32.totalorder %s1061_s14, 0 }
 0x134   : > { %s1501_s18 = sshrl.u32 (!%p1064_p9), %s1541_s11, 1 }
 0x135   : > { %778 = sbr.rel (%p1064_p9) target bundleno = 344 (0x158), region = 52  ;;  %p1065_p10 = scmp.le.s32.totalorder (!%p1064_p9), %s1501_s18, 0 }
 0x13a   : > { %955 = sbr.rel (%p1065_p10) target bundleno = 327 (0x147), region = 133  ;;  %s1252_s24 = smov (!%p1065_p10), %s1495_s16  }
 0x13b   : > { %s1256_s29 = smov (!%p1065_p10), %s1484_s21   ;;  %s1260_s10 = smov (!%p1065_p10), 0  }
 0x13c   : > { %s1264_s19 = smov (!%p1065_p10), 0  }
 0x13f LB: >> { %v795_v49 = vld [vmem:[%s1258_s29] sm:$0xf]  ;;  %v797_v50 = vld [vmem:[%s1258_s29 + $0x4] sm:$0xf]  ;;  %s799_s23 = sadd.s32 1, %s1262_s10  ;;  %s789_s19 = sadd.s32 1, %s1266_s19   ;;  %s1266_s19 = sphi %s1264_s19, %s789_s19   ;;  %s1262_s10 = sphi %s1260_s10, %s1261_s10   ;;  %s1258_s29 = sphi %s1256_s29, %s804_s29   ;;  %s1254_s24 = sphi %s1252_s24, %s805_s24  }
 0x140   : >> { %796 = vst [vmem:[%s1254_s24] sm:$0xf] %v795_v49  ;;  %798 = vst [vmem:[%s1254_s24 + $0x4] sm:$0xf] %v797_v50  ;;  %p800_p11 = scmp.ge.s32.totalorder %s799_s23, %s1501_s18  ;;  %p788_p12 = scmp.ge.s32.totalorder %s789_s19, %s1501_s18 }
 0x142   : >> { %s1543_s23 = smov (%p800_p11, %s799_s23), 0  ;;  %791 = sbr.rel (!%p788_p12) target bundleno = 319 (0x13f), region = 139 }
 0x143   : >> { %s1066_s26 = sshll.u32 %s1543_s23, 3  ;;  %s1261_s10 = smov %s1543_s23  }
 0x144   : >> { %s804_s29 = scalar_lea.vmem %s1484_s21, %s1066_s26 [#allocation2]   ;;  %s805_s24 = scalar_lea.vmem %s1495_s16, %s1066_s26  }
 0x147 PF: > { %s1511_s27 = sand.u32 1, %s1541_s11   ;;  %s1083_s30 = sshll.u32 %s1501_s18, 3 }
 0x148   : > { %s810_s8 = scalar_lea.vmem %s1484_s21, %s1083_s30 [#allocation2]   ;;  %s812_s17 = scalar_lea.vmem %s1495_s16, %s1083_s30  }
 0x149   : > { %p1071_p13 = scmp.le.s32.totalorder %s1511_s27, 0 }
 0x14a   : > { %s1268_s20 = smov (!%p1071_p13), %s812_s17   ;;  %s1272_s7 = smov (!%p1071_p13), %s810_s8  }
 0x14b   : > { %969 = sbr.rel (%p1071_p13) target bundleno = 344 (0x158), region = 144  ;;  %s1276_s9 = smov (!%p1071_p13), 0  }
 0x14c   : > { %s1280_s12 = smov (!%p1071_p13), 0  }
 0x150 LB: >> { %v822_v51 = vld [vmem:[%s1274_s7] sm:$0xf]  ;;  %s824_s11 = sadd.s32 1, %s1278_s9  ;;  %s816_s12 = sadd.s32 1, %s1282_s12   ;;  %s1282_s12 = sphi %s1280_s12, %s816_s12   ;;  %s1278_s9 = sphi %s1276_s9, %s1277_s9   ;;  %s1274_s7 = sphi %s1272_s7, %s829_s7   ;;  %s1270_s20 = sphi %s1268_s20, %s830_s20  }
 0x151   : >> { %823 = vst [vmem:[%s1270_s20] sm:$0xf] %v822_v51  ;;  %p825_p0 = scmp.ge.s32.totalorder %s824_s11, %s1511_s27  ;;  %p815_p1 = scmp.ge.s32.totalorder %s816_s12, %s1511_s27 }
 0x153   : >> { %s1545_s11 = smov (%p825_p0, %s824_s11), 0  ;;  %818 = sbr.rel (!%p815_p1) target bundleno = 336 (0x150), region = 150 }
 0x154   : >> { %s1072_s21 = sshll.u32 %s1545_s11, 2  ;;  %s1277_s9 = smov %s1545_s11  }
 0x155   : >> { %s829_s7 = scalar_lea.vmem %s810_s8, %s1072_s21 [#allocation2]   ;;  %s830_s20 = scalar_lea.vmem %s812_s17, %s1072_s21  }
 0x158 PF: > { %p13_p2 = scmp.ge.s32.totalorder %s1335_s25, 6   ;;  %s1537_s21 = smov %s1246_s22 }
 0x159   : > { %s1538_s22 = smov %s1343_s28  ;;  %s1539_s23 = smov %s1335_s25 }
 0x15a   :  { %15 = sbr.rel (!%p13_p2) target bundleno = 2 (0x2), region = 161 }

// kernel: net_forward.5
= control target key start
LH: loop header
LB: loop body
LE: loop exit
PB: predicated region body
PF: predicated region fallthrough
CT: control target
= control target key end

     0   :  { %v768_v1 = vmov 0   ;;  %v98_v20 = vlaneseq  ;;  %v769_v25 = vmov 1966171168   ;;  %vm421_vm0 = vcmask 1043456   ;;  %s970_s0 = inlined_call_operand.vmem [shape: bf16[2,400], index: 0, kind: input, shape index: {}]   ;;  %s971_s1 = inlined_call_operand.vmem [shape: bf16[400,120], index: 1, kind: input, shape index: {}]   ;;  %s972_s2 = inlined_call_operand.vmem [shape: f32[1,120], index: 2, kind: input, shape index: {}]   ;;  %s973_s3 = inlined_call_operand.vmem [shape: bf16[120,84], index: 3, kind: input, shape index: {}]   ;;  %s974_s4 = inlined_call_operand.vmem [shape: f32[1,84], index: 4, kind: input, shape index: {}]   ;;  %s975_s5 = inlined_call_operand.vmem [shape: bf16[84,10], index: 5, kind: input, shape index: {}]   ;;  %s976_s6 = inlined_call_operand.vmem [shape: f32[1,10], index: 6, kind: input, shape index: {}]   ;;  %s977_s7 = inlined_call_operand.hbm [shape: f32[2,10], index: 7, kind: output, shape index: {}]  }
   0x1   :  { %v707_v0 = vld [vmem:[%s971_s1 + $0x78] sm:$0xff]   ;;  %308 = vmatprep.subr.bf16.mxu1 %v768_v1  ;;  %v710_v4 = vld [vmem:[%s971_s1 + $0x70] sm:$0xff]   ;;  %v713_v7 = vld [vmem:[%s971_s1 + $0x68] sm:$0xff]   ;;  %v96_v26 = vunpack.c.l.s4 %v769_v25  ;;  %vm264_vm1 = vcmask 130048   ;;  %v770_v39 = vmov 0.0  }
   0x2   :  { %v708_v2 = vld [vmem:[%s971_s1 + $0xb8] sm:$0xff]   ;;  %628 = vmatprep.subr.bf16.mxu0 %v707_v0  ;;  %v711_v5 = vld [vmem:[%s971_s1 + $0xb0] sm:$0xff]   ;;  %v714_v8 = vld [vmem:[%s971_s1 + $0xa8] sm:$0xff]   ;;  %v99_v27 = vshrl.u32 %v98_v20, 7 }
   0x3   :  { %v709_v3 = vld [vmem:[%s971_s1 + $0x38] sm:$0xff]   ;;  %309 = vmatpush1.bf16.msra.mxu1 %v708_v2  ;;  %v712_v6 = vld [vmem:[%s971_s1 + $0x30] sm:$0xff]   ;;  %v715_v9 = vld [vmem:[%s971_s1 + $0x28] sm:$0xff]   ;;  %v97_v31 = vunpack.c.0.s8 %v96_v26 }
   0x4   :  { %629 = vmatpush3.bf16.msra.mxu0 %v709_v3  ;;  %310 = vmatprep.subr.bf16.mxu1 %v768_v1  ;;  %v716_v10 = vld [vmem:[%s971_s1 + $0x60] sm:$0xff]   ;;  %v719_v13 = vld [vmem:[%s971_s1 + $0x58] sm:$0xff]   ;;  %v722_v16 = vld [vmem:[%s971_s1 + $0x50] sm:$0xff]  }
   0x5   :  { %630 = vmatprep.subr.bf16.mxu0 %v710_v4  ;;  %v717_v11 = vld [vmem:[%s971_s1 + $0xa0] sm:$0xff]   ;;  %v720_v14 = vld [vmem:[%s971_s1 + $0x98] sm:$0xff]   ;;  %v723_v17 = vld [vmem:[%s971_s1 + $0x90] sm:$0xff]   ;;  %v100_v33 = vsub.s32 %v97_v31, %v99_v27 }
   0x6   :  { %v718_v12 = vld [vmem:[%s971_s1 + $0x20] sm:$0xff]   ;;  %v721_v15 = vld [vmem:[%s971_s1 + $0x18] sm:$0xff]   ;;  %v724_v18 = vld [vmem:[%s971_s1 + $0x10] sm:$0xff]  }
   0x7   :  { %311 = vmatpush1.bf16.msra.mxu1 %v711_v5  ;;  %v725_v19 = vld [vmem:[%s971_s1 + $0x48] sm:$0xff]   ;;  %v583_v23 = vld.sshfl [vmem:[%s970_s0] sm:$0x33 pattern:$0x75316420]  ;;  %v733_v41 = vld [vmem:[%s973_s3 + $0x30] sm:$0xff]  }
   0x8   :  { %631 = vmatpush3.bf16.msra.mxu0 %v712_v6  ;;  %312 = vmatprep.subr.bf16.mxu1 %v768_v1  ;;  %v726_v21 = vld [vmem:[%s971_s1 + $0x88] sm:$0xff]   ;;  %v728_v24 = vld [vmem:[%s971_s1 + $0x40] sm:$0xff]   ;;  %v732_v28 = vld [vmem:[%s973_s3 + $0x38] ss:$0 sps:$4 sm:$0xff]   ;;  %v94_v30 = vcombine.high %v583_v23, %v583_v23  ;;  %v101_v37 = vrot.slane %v583_v23, %v100_v33 }
   0x9   :  { %632 = vmatprep.subr.bf16.mxu0 %v713_v7  ;;  %v727_v22 = vld [vmem:[%s971_s1 + $0x8] sm:$0xff]   ;;  %v729_v29 = vld [vmem:[%s971_s1 + $0x80] sm:$0xff]   ;;  %v423_v35 = vsel %vm421_vm0, %v732_v28, 0 }
   0xa   :  { %v730_v32 = vld [vmem:[%s971_s1] sm:$0xff]   ;;  %v108_v36 = vrot.slane %v94_v30, %v100_v33  ;;  %v109_v40 = vcombine.high %v101_v37, %v101_v37 }
   0xb   :  { %313 = vmatpush1.bf16.msra.mxu1 %v714_v8  ;;  %v731_v34 = vld [vmem:[%s971_s1 + $0xc0] sm:$0xff]  }
   0xc   :  { %633 = vmatpush3.bf16.msra.mxu0 %v715_v9  ;;  %314 = vmatprep.subr.bf16.mxu1 %v768_v1  ;;  %v110_v38 = vcombine.high %v108_v36, %v108_v36 }
   0xd   :  { %634 = vmatprep.subr.bf16.mxu0 %v716_v10  ;;  %300 = vmatprep.mubr.bf16.mxu0 %v108_v36 }
   0xe   :  { %609 = vmatprep.mubr.msk.bf16.mxu1 %vm264_vm1, %v110_v38 }
   0xf   :  { %315 = vmatpush1.bf16.msra.mxu1 %v717_v11 }
  0x10   :  { %635 = vmatpush3.bf16.msra.mxu0 %v718_v12  ;;  %316 = vmatprep.subr.bf16.mxu1 %v768_v1 }
  0x11   :  { %636 = vmatprep.subr.bf16.mxu0 %v719_v13 }
  0x13   :  { %317 = vmatpush1.bf16.msra.mxu1 %v720_v14 }
  0x14   :  { %637 = vmatpush3.bf16.msra.mxu0 %v721_v15  ;;  %318 = vmatprep.subr.bf16.mxu1 %v768_v1 }
  0x15   :  { %638 = vmatprep.subr.bf16.mxu0 %v722_v16 }
  0x17   :  { %319 = vmatpush1.bf16.msra.mxu1 %v723_v17 }
  0x18   :  { %639 = vmatpush3.bf16.msra.mxu0 %v724_v18  ;;  %320 = vmatprep.subr.bf16.mxu1 %v768_v1 }
  0x19   :  { %640 = vmatprep.subr.bf16.mxu0 %v725_v19 }
  0x1b   :  { %321 = vmatpush1.bf16.msra.mxu1 %v726_v21 }
  0x1c   :  { %641 = vmatpush3.bf16.msra.mxu0 %v727_v22  ;;  %322 = vmatprep.subr.bf16.mxu1 %v768_v1 }
  0x1d   :  { %642 = vmatprep.subr.bf16.mxu0 %v728_v24 }
  0x1f   :  { %323 = vmatpush1.bf16.msra.mxu1 %v729_v29 }
  0x20   :  { %643 = vmatpush3.bf16.msra.mxu0 %v730_v32  ;;  %338 = vmatprep.subr.bf16.mxu1 %v768_v1 }
  0x21   :  { %666 = vmatprep.subr.bf16.mxu0 %v770_v39 }
  0x23   :  { %301 = vmatmul.mubr.bf16.vlgmr.msra.gmra.mxu0 %v101_v37  ;;  %339 = vmatpush2.bf16.msra.mxu1 %v731_v34 }
  0x24   :  { %667 = vmatpush3.bf16.msra.mxu0 %v423_v35 }
  0x25   :  { %12 = vsyncpa [#allocation3], 0  ;;  %668 = vmatprep.subr.bf16.mxu0 %v770_v39  ;;  %686 = vmatprep.subr.bf16.mxu1 %v770_v39  ;;  %v734_v42 = vld [vmem:[%s973_s3 + $0x28] sm:$0xff]   ;;  %v735_v43 = vld [vmem:[%s973_s3 + $0x20] sm:$0xff]   ;;  %vm771_vm2 = vmmov 0   ;;  %vm522_vm3 = vcmask 1041408  }
  0x26   :  { %341 = vmatmul.mubr.bf16.vlgmr.msra.gmra.mxu1 %v109_v40  ;;  %v736_v44 = vld [vmem:[%s973_s3 + $0x18] sm:$0xff]   ;;  %v737_v45 = vld [vmem:[%s973_s3 + $0x10] sm:$0xff]   ;;  %v738_v46 = vld [vmem:[%s973_s3 + $0x8] sm:$0xff]   ;;  %682 = vmatprep.mubr.msk.bf16.mxu0 %vm771_vm2, %v770_v39  ;;  %vm417_vm4 = vcmask 982016   ;;  %vm518_vm5 = vcmask 687104   ;;  %s772_s12 = smov [#allocation2]  }
  0x27   :  { %v739_v47 = vld [vmem:[%s973_s3] sm:$0xff]   ;;  %698 = vmatprep.mubr.msk.bf16.mxu1 %vm771_vm2, %v770_v39  ;;  %v740_v48 = vld [vmem:[%s975_s5 + $0x28] ss:$0 sps:$4 sm:$0x33]   ;;  %v742_v51 = vld [vmem:[%s975_s5 + $0x18] sm:$0xff]   ;;  %vm566_vm6 = vcmask 74752  }
  0x28   :  { %669 = vmatpush3.bf16.msra.mxu0 %v733_v41  ;;  %v524_v49 = vsel %vm522_vm3, %v740_v48, 0  ;;  %v741_v50 = vld [vmem:[%s975_s5 + $0x20] sm:$0xff]   ;;  %v743_v52 = vld [vmem:[%s975_s5 + $0x10] sm:$0xff]   ;;  %v744_v3 = vld [vmem:[%s975_s5 + $0x8] sm:$0xff]  }
  0x29   :  { %670 = vmatprep.subr.bf16.mxu0 %v770_v39  ;;  %687 = vmatpush3.bf16.msra.mxu1 %v524_v49  ;;  %v582_v55 = vld [vmem:[%s972_s2] ss:$0 sm:$0xff] }
  0x2a   :  { %688 = vmatprep.subr.bf16.mxu1 %v770_v39  ;;  %v745_v4 = vld [vmem:[%s975_s5] sm:$0xff]   ;;  %s574_s5 = sshll.u32 %s772_s12, 4  ;;  %s575_s5 = int_to_ptr.vmem [resolvable:$true] %s574_s5 }
  0x2b   :  { %v610_v5 = vld [vmem:[%s974_s4] ss:$0 sm:$0xff]  ;;  %s746_s4 = scalar_lea.vmem %s575_s5, 32  ;;  %p751_p1 = scmp.lt.s32.totalorder %s575_s5, %s575_s5 }
  0x2c   :  { %671 = vmatpush3.bf16.msra.mxu0 %v734_v42  ;;  %v620_v13 = vld [vmem:[%s976_s6] ss:$0 sm:$0xff]  ;;  %p747_p0 = scmp.ne.s32.totalorder %s575_s5, %s746_s4  ;;  %p752_p2 = scmp.lt.s32.totalorder %s746_s4, %s746_s4 }
  0x2d   :  { %672 = vmatprep.subr.bf16.mxu0 %v770_v39  ;;  %689 = vmatpush3.bf16.msra.mxu1 %v741_v50 }
  0x2e   :  { %690 = vmatprep.subr.bf16.mxu1 %v770_v39  ;;  %p753_p3 = por %p752_p2, %p751_p1 }
  0x30   :  { %673 = vmatpush3.bf16.msra.mxu0 %v735_v43  ;;  %p754_p4 = pnand %p753_p3, %p747_p0 }
  0x31   :  { %674 = vmatprep.subr.bf16.mxu0 %v770_v39  ;;  %691 = vmatpush3.bf16.msra.mxu1 %v742_v51 }
  0x32   :  { %692 = vmatprep.subr.bf16.mxu1 %v770_v39 }
  0x34   :  { %675 = vmatpush3.bf16.msra.mxu0 %v736_v44 }
  0x35   :  { %676 = vmatprep.subr.bf16.mxu0 %v770_v39  ;;  %693 = vmatpush3.bf16.msra.mxu1 %v743_v52 }
  0x36   :  { %694 = vmatprep.subr.bf16.mxu1 %v770_v39 }
  0x38   :  { %677 = vmatpush3.bf16.msra.mxu0 %v737_v45 }
  0x39   :  { %678 = vmatprep.subr.bf16.mxu0 %v770_v39  ;;  %695 = vmatpush3.bf16.msra.mxu1 %v744_v3 }
  0x3a   :  { %696 = vmatprep.subr.bf16.mxu1 %v770_v39 }
  0x3c   :  { %679 = vmatpush3.bf16.msra.mxu0 %v738_v46 }
  0x3d   :  { %680 = vmatprep.subr.bf16.mxu0 %v770_v39  ;;  %697 = vmatpush3.bf16.msra.mxu1 %v745_v4 }
  0x40   :  { %681 = vmatpush3.bf16.msra.mxu0 %v739_v47 }
  0xe3   :  { %v644_v53 = vpop.f32.mrf.mxu0 }
  0xe5   :  { %v645_v54 = vpop.f32.mrf.mxu0 }
  0xe6   :  { %v646_v56 = vadd.f32 %v645_v54, %v644_v53  ;;  %v342_v57 = vpop.f32.mrf.mxu1 }
  0xe7   :  { %v647_v58 = vpop.f32.mrf.mxu0 }
  0xe8   :  { %v303_v59 = vadd.f32 %v646_v56, %v582_v55  ;;  %v344_v60 = vpop.f32.mrf.mxu1 }
  0xe9   :  { %v648_v61 = vpop.f32.mrf.mxu0 }
  0xea   :  { %v343_v62 = vadd.f32 %v342_v57, %v303_v59  ;;  %v345_v63 = vpop.f32.mrf.mxu1 }
  0xec   :  { %v348_v0 = vmax.f32 %v343_v62, 0.0  ;;  %v346_v1 = vpop.f32.mrf.mxu1 }
  0xee   :  { %v349_v2 = vpack.c.bf16 %v348_v0, %v348_v0 }
  0xf0   :  { %683 = vmatmul.mubr.msk.bf16.vlgmr.msra.gmra.mxu0 %vm417_vm4, %v349_v2 }
 0x1b0   :  { %v459_v6 = vpop.f32.mrf.mxu0 }
 0x1b1   :  { %v460_v7 = vadd.f32 %v610_v5, %v459_v6 }
 0x1b2   :  { %v684_v8 = vpop.f32.mrf.mxu0 }
 0x1b3   :  { %v465_v9 = vmax.f32 %v460_v7, 0.0 }
 0x1b4   :  { %v462_v10 = vpop.f32.mrf.mxu0 }
 0x1b5   :  { %v466_v11 = vpack.c.bf16 %v465_v9, %v465_v9 }
 0x1b6   :  { %v685_v12 = vpop.f32.mrf.mxu0 }
 0x1b7   :  { %699 = vmatmul.mubr.msk.bf16.vlgmr.msra.gmra.mxu1 %vm518_vm5, %v466_v11 }
 0x277   :  { %v560_v14 = vpop.f32.mrf.mxu1 }
 0x278   :  { %v561_v15 = vadd.f32 %v620_v13, %v560_v14 }
 0x279   :  { %v700_v16 = vpop.f32.mrf.mxu1 }
 0x27a   :  { %567 = vst.msk [vmem:[#allocation2] sm:$0x3] %vm566_vm6, %v561_v15 }
 0x27b   :  { %v563_v17 = vpop.f32.mrf.mxu1 }
 0x27c   :  { %757 = shalt.err (!%p754_p4)
}
 0x27d   :  { %577 = dma.vmem_to_hbm [thread:$0]  %s575_s5, 32, %s977_s7, [#allocation3]   ;;  %v701_v18 = vpop.f32.mrf.mxu1 }
 0x27e   :  { %766 = dma.done.wait [#allocation3], 32  }
 0x27f   :  { %767 = vsyncadd [#allocation3], 4294967264 }
 0x280   :  { %581 = vsyncpa [#allocation3], 1 }

</bundles_post_ra>
